<compile_context>
chip_gen: v7x
topology: tpu7x:2x2x1
jax: 0.10.0
libtpu: 0.0.40
codegen_flags: <defaults>
</compile_context>

<pallas_src>
import functools

import jax
import jax.numpy as jnp
from jax import lax
from jax.experimental import pallas as pl
from jax.experimental.pallas import tpu as pltpu


def _round_up(x, m):
    return ((x + m - 1) // m) * m


def lstm_seq_kernel(emb_ref, w_fused_ref, b_g_ref, w_lin_ref, b_lin_ref,
                    h0_ref, c0_ref,
                    logits_ref, h_out_ref, c_out_ref,
                    xz_scr, hs_scr,
                    *, T, B_pad, E, H_pad):
    """Whole-sequence LSTM + output projection in one kernel invocation.

    xz_scr : (T*B_pad, H_pad+E) staging buffer, columns [0:H_pad]=h, [H_pad:]=x
    hs_scr : (T*B_pad, H_pad)   per-timestep hidden states for batched proj.
    """
    # Stage ALL embeddings once into the x-columns of the staging buffer.
    xz_scr[pl.ds(0, T * B_pad), pl.ds(H_pad, E)] = emb_ref[...]

    # Hoist the bias broadcast out of the (unrolled) time loop.
    bias_g = jnp.broadcast_to(b_g_ref[...], (B_pad, 4 * H_pad))
    w_fused = w_fused_ref[...]

    def step(t, carry):
        h_prev, c_prev = carry
        row = pl.multiple_of(t * B_pad, B_pad)

        # Write h_{t-1} into the lane-aligned h columns, then read [h | x_t].
        xz_scr[pl.ds(row, B_pad), pl.ds(0, H_pad)] = h_prev
        xz_t = xz_scr[pl.ds(row, B_pad), :]                # (B_pad, H_pad+E)

        # Single fused gate matmul: [h | x] @ [W_hh^T ; W_ih^T] -> (B_pad, 4*H_pad)
        gates = jnp.dot(xz_t, w_fused,
                        preferred_element_type=jnp.float32) + bias_g

        # Gate slices fall on 128-lane (vreg) boundaries.
        i_g = jax.nn.sigmoid(gates[:, 0 * H_pad:1 * H_pad])
        f_g = jax.nn.sigmoid(gates[:, 1 * H_pad:2 * H_pad])
        g_g = jnp.tanh(gates[:, 2 * H_pad:3 * H_pad])
        o_g = jax.nn.sigmoid(gates[:, 3 * H_pad:4 * H_pad])

        c_new = f_g * c_prev + i_g * g_g
        h_new = o_g * jnp.tanh(c_new)

        hs_scr[pl.ds(row, B_pad), :] = h_new
        return (h_new, c_new)

    h_T, c_T = lax.fori_loop(0, T, step, (h0_ref[...], c0_ref[...]),
                             unroll=True)

    # Batched output projection: one lane-dense matmul + one slab store.
    logits_ref[...] = (jnp.dot(hs_scr[...], w_lin_ref[...],
                               preferred_element_type=jnp.float32)
                       + b_lin_ref[...])
    h_out_ref[...] = h_T
    c_out_ref[...] = c_T


def lstm_module_forward(tokens, prestate, params):
    """JAX/Pallas equivalent of LSTMModule.forward(x, prestate)."""
    emb_table, w_ih, w_hh, b_ih, b_hh, w_lin, b_lin = params
    B, T = tokens.shape
    V, E = emb_table.shape
    H = w_hh.shape[1]

    B_pad = _round_up(B, 8)      # f32 sublane tile
    H_pad = _round_up(H, 128)    # lane tile per gate
    V_pad = _round_up(V, 128)    # lane-dense logits

    # ---- repack / zero-pad parameters (one-time XLA glue) ----
    def pad_gate_cols(w):        # (..., 4H) -> (..., 4*H_pad), per-gate padding
        lead = w.shape[:-1]
        w4 = w.reshape(lead + (4, H))
        w4 = jnp.pad(w4, [(0, 0)] * len(lead) + [(0, 0), (0, H_pad - H)])
        return w4.reshape(lead + (4 * H_pad,))

    w_hh_t = pad_gate_cols(w_hh.T)                           # (H, 4*H_pad)
    w_hh_t = jnp.pad(w_hh_t, ((0, H_pad - H), (0, 0)))       # (H_pad, 4*H_pad)
    w_ih_t = pad_gate_cols(w_ih.T)                           # (E, 4*H_pad)
    w_fused = jnp.concatenate([w_hh_t, w_ih_t], axis=0)      # (H_pad+E, 4*H_pad)
    b_gates = pad_gate_cols(b_ih + b_hh)[None, :]            # (1, 4*H_pad)

    w_lin_t = jnp.pad(w_lin.T, ((0, H_pad - H), (0, V_pad - V)))  # (H_pad, V_pad)
    b_lin_p = jnp.pad(b_lin, (0, V_pad - V))[None, :]             # (1, V_pad)

    # ---- time-major embedding gather, batch padded to B_pad ----
    # TODO(synk): the nn.Embedding gather stays in XLA (jnp.take); an in-kernel
    # gather would need manual per-row DMA and is not worthwhile here.
    tokens_p = jnp.pad(tokens, ((0, B_pad - B), (0, 0)))
    emb_t = jnp.take(emb_table, tokens_p.T, axis=0)          # (T, B_pad, E)
    emb_flat = emb_t.reshape(T * B_pad, E)

    h0 = jnp.pad(prestate[0][0], ((0, B_pad - B), (0, H_pad - H)))
    c0 = jnp.pad(prestate[1][0], ((0, B_pad - B), (0, H_pad - H)))

    grid_spec = pltpu.PrefetchScalarGridSpec(
        num_scalar_prefetch=0,
        grid=(1,),
        in_specs=[
            pl.BlockSpec((T * B_pad, E), lambda i: (0, 0)),        # embeddings
            pl.BlockSpec((H_pad + E, 4 * H_pad), lambda i: (0, 0)),  # fused W
            pl.BlockSpec((1, 4 * H_pad), lambda i: (0, 0)),        # gate bias
            pl.BlockSpec((H_pad, V_pad), lambda i: (0, 0)),        # W_lin^T
            pl.BlockSpec((1, V_pad), lambda i: (0, 0)),            # b_lin
            pl.BlockSpec((B_pad, H_pad), lambda i: (0, 0)),        # h0
            pl.BlockSpec((B_pad, H_pad), lambda i: (0, 0)),        # c0
        ],
        out_specs=[
            pl.BlockSpec((T * B_pad, V_pad), lambda i: (0, 0)),    # logits slab
            pl.BlockSpec((B_pad, H_pad), lambda i: (0, 0)),        # final h
            pl.BlockSpec((B_pad, H_pad), lambda i: (0, 0)),        # final c
        ],
        scratch_shapes=[
            pltpu.VMEM((T * B_pad, H_pad + E), jnp.float32),       # [h | x]
            pltpu.VMEM((T * B_pad, H_pad), jnp.float32),           # all h_t
        ],
    )

    kernel = functools.partial(lstm_seq_kernel,
                               T=T, B_pad=B_pad, E=E, H_pad=H_pad)

    logits_slab, h_T, c_T = pl.pallas_call(
        kernel,
        out_shape=(
            jax.ShapeDtypeStruct((T * B_pad, V_pad), jnp.float32),
            jax.ShapeDtypeStruct((B_pad, H_pad), jnp.float32),
            jax.ShapeDtypeStruct((B_pad, H_pad), jnp.float32),
        ),
        grid_spec=grid_spec,
        compiler_params=pltpu.CompilerParams(
            dimension_semantics=("arbitrary",)),
    )(emb_flat, w_fused, b_gates, w_lin_t, b_lin_p, h0, c0)

    # Un-pad and return batch-first logits + (1, B, H) state like torch.
    logits = jnp.transpose(
        logits_slab.reshape(T, B_pad, V_pad)[:, :B, :V], (1, 0, 2))
    state = (h_T[:B, :H][None, :, :], c_T[:B, :H][None, :, :])
    return logits, state


def reference_forward(tokens, prestate, params):
    """Pure-JAX reference (lax.scan) mirroring torch.nn.LSTM semantics."""
    emb_table, w_ih, w_hh, b_ih, b_hh, w_lin, b_lin = params
    H = w_hh.shape[1]
    emb = jnp.take(emb_table, tokens, axis=0)          # (B, T, E)
    emb_t = jnp.transpose(emb, (1, 0, 2))              # (T, B, E)
    h0, c0 = prestate[0][0], prestate[1][0]

    def step(carry, x_t):
        h, c = carry
        gates = x_t @ w_ih.T + h @ w_hh.T + b_ih + b_hh
        i = jax.nn.sigmoid(gates[:, 0 * H:1 * H])
        f = jax.nn.sigmoid(gates[:, 1 * H:2 * H])
        g = jnp.tanh(gates[:, 2 * H:3 * H])
        o = jax.nn.sigmoid(gates[:, 3 * H:4 * H])
        c_new = f * c + i * g
        h_new = o * jnp.tanh(c_new)
        return (h_new, c_new), h_new

    (h_T, c_T), hs = lax.scan(step, (h0, c0), emb_t)
    logits = jnp.einsum('tbh,vh->tbv', hs, w_lin) + b_lin
    return jnp.transpose(logits, (1, 0, 2)), (h_T[None], c_T[None])


def make_params(key, num_word, embedding_size, lstm_size):
    ks = jax.random.split(key, 7)
    H, E, V = lstm_size, embedding_size, num_word
    emb_table = 0.1 * jax.random.normal(ks[0], (V, E), jnp.float32)
    w_ih = 0.1 * jax.random.normal(ks[1], (4 * H, E), jnp.float32)
    w_hh = 0.1 * jax.random.normal(ks[2], (4 * H, H), jnp.float32)
    b_ih = 0.1 * jax.random.normal(ks[3], (4 * H,), jnp.float32)
    b_hh = 0.1 * jax.random.normal(ks[4], (4 * H,), jnp.float32)
    w_lin = 0.1 * jax.random.normal(ks[5], (V, H), jnp.float32)
    b_lin = 0.1 * jax.random.normal(ks[6], (V,), jnp.float32)
    return (emb_table, w_ih, w_hh, b_ih, b_hh, w_lin, b_lin)


if __name__ == "__main__":
    num_word = 128       # vocab size V
    seq_size = 8         # T
    embedding_size = 32  # E
    lstm_size = 32       # H
    batch = 2            # B

    key = jax.random.PRNGKey(0)
    k_tok, k_par = jax.random.split(key)
    tokens = jax.random.randint(k_tok, (batch, seq_size), 0, num_word, jnp.int32)
    params = make_params(k_par, num_word, embedding_size, lstm_size)

    # zero_state(batch) -> (1, B, H) zeros for both h and c
    prestate = (jnp.zeros((1, batch, lstm_size), jnp.float32),
                jnp.zeros((1, batch, lstm_size), jnp.float32))

    logits, state = lstm_module_forward(tokens, prestate, params)
    jax.block_until_ready((logits, state))

    ref_logits, ref_state = reference_forward(tokens, prestate, params)
    assert logits.shape == (batch, seq_size, num_word)
    assert state[0].shape == (1, batch, lstm_size)
    assert state[1].shape == (1, batch, lstm_size)
    assert jnp.allclose(logits, ref_logits, atol=1e-3, rtol=1e-3)
    assert jnp.allclose(state[0], ref_state[0], atol=1e-3, rtol=1e-3)
    assert jnp.allclose(state[1], ref_state[1], atol=1e-3, rtol=1e-3)

    print("KERNEL_OK")
</pallas_src>

<mosaic_0001>
module attributes {stable_mosaic.version = 11 : i64} {
  func.func @lstm_seq_kernel(%arg0: i32, %arg1: memref<64x32xf32, #tpu.memory_space<vmem>>, %arg2: memref<160x512xf32, #tpu.memory_space<vmem>>, %arg3: memref<1x512xf32, #tpu.memory_space<vmem>>, %arg4: memref<128x128xf32, #tpu.memory_space<vmem>>, %arg5: memref<1x128xf32, #tpu.memory_space<vmem>>, %arg6: memref<8x128xf32, #tpu.memory_space<vmem>>, %arg7: memref<8x128xf32, #tpu.memory_space<vmem>>, %arg8: memref<64x128xf32, #tpu.memory_space<vmem>>, %arg9: memref<8x128xf32, #tpu.memory_space<vmem>>, %arg10: memref<8x128xf32, #tpu.memory_space<vmem>>, %arg11: memref<64x160xf32, #tpu.memory_space<vmem>>, %arg12: memref<64x128xf32, #tpu.memory_space<vmem>>) attributes {dimension_semantics = [#tpu.dimension_semantics<arbitrary>], iteration_bounds = array<i64: 1>, scalar_prefetch = 0 : i64, scratch_operands = 2 : i64, tpu.core_type = #tpu.core_type<tc>, window_params = [{pipeline_mode = #tpu.pipeline_mode<synchronous>, transform_indices = @transform_0, window_bounds = array<i64: 64, 32>}, {pipeline_mode = #tpu.pipeline_mode<synchronous>, transform_indices = @transform_1, window_bounds = array<i64: 160, 512>}, {pipeline_mode = #tpu.pipeline_mode<synchronous>, transform_indices = @transform_2, window_bounds = array<i64: 1, 512>}, {pipeline_mode = #tpu.pipeline_mode<synchronous>, transform_indices = @transform_3, window_bounds = array<i64: 128, 128>}, {pipeline_mode = #tpu.pipeline_mode<synchronous>, transform_indices = @transform_4, window_bounds = array<i64: 1, 128>}, {pipeline_mode = #tpu.pipeline_mode<synchronous>, transform_indices = @transform_5, window_bounds = array<i64: 8, 128>}, {pipeline_mode = #tpu.pipeline_mode<synchronous>, transform_indices = @transform_6, window_bounds = array<i64: 8, 128>}, {pipeline_mode = #tpu.pipeline_mode<synchronous>, transform_indices = @transform_7, window_bounds = array<i64: 64, 128>}, {pipeline_mode = #tpu.pipeline_mode<synchronous>, transform_indices = @transform_8, window_bounds = array<i64: 8, 128>}, {pipeline_mode = #tpu.pipeline_mode<synchronous>, transform_indices = @transform_9, window_bounds = array<i64: 8, 128>}]} {
    %c0 = arith.constant 0 : index
    %c0_0 = arith.constant 0 : index
    %0 = vector.load %arg1[%c0, %c0_0] : memref<64x32xf32, #tpu.memory_space<vmem>>, vector<64x32xf32>
    %c0_1 = arith.constant 0 : index
    %c128 = arith.constant 128 : index
    %1 = vector.load %arg11[%c0_1, %c128] : memref<64x160xf32, #tpu.memory_space<vmem>>, vector<64x32xf32>
    tpu.vector_store %arg11[%c0_1, %c128], %0 {strides = array<i32>} : memref<64x160xf32, #tpu.memory_space<vmem>>, vector<64x32xf32>,
    %c0_2 = arith.constant 0 : index
    %c0_3 = arith.constant 0 : index
    %2 = vector.load %arg3[%c0_2, %c0_3] : memref<1x512xf32, #tpu.memory_space<vmem>>, vector<1x512xf32>
    %3 = vector.shape_cast %2 : vector<1x512xf32> to vector<1x512xf32>
    %4 = vector.broadcast %3 : vector<1x512xf32> to vector<8x512xf32>
    %c0_4 = arith.constant 0 : index
    %c0_5 = arith.constant 0 : index
    %5 = vector.load %arg2[%c0_4, %c0_5] : memref<160x512xf32, #tpu.memory_space<vmem>>, vector<160x512xf32>
    %c0_6 = arith.constant 0 : index
    %c0_7 = arith.constant 0 : index
    %6 = vector.load %arg6[%c0_6, %c0_7] : memref<8x128xf32, #tpu.memory_space<vmem>>, vector<8x128xf32>
    %c0_8 = arith.constant 0 : index
    %c0_9 = arith.constant 0 : index
    %7 = vector.load %arg7[%c0_8, %c0_9] : memref<8x128xf32, #tpu.memory_space<vmem>>, vector<8x128xf32>
    %c0_i32 = arith.constant 0 : i32
    %c8_i32 = arith.constant 8 : i32
    %8 = arith.muli %c0_i32, %c8_i32 : i32
    %9 = tpu.assume_multiple %8, 8 : i32
    %10 = arith.index_cast %9 : i32 to index
    %c0_10 = arith.constant 0 : index
    %11 = vector.load %arg11[%10, %c0_10] : memref<64x160xf32, #tpu.memory_space<vmem>>, vector<8x128xf32>
    tpu.vector_store %arg11[%10, %c0_10], %6 {strides = array<i32>} : memref<64x160xf32, #tpu.memory_space<vmem>>, vector<8x128xf32>,
    %12 = arith.index_cast %9 : i32 to index
    %c0_11 = arith.constant 0 : index
    %13 = vector.load %arg11[%12, %c0_11] : memref<64x160xf32, #tpu.memory_space<vmem>>, vector<8x160xf32>
    %cst = arith.constant dense<0.000000e+00> : vector<8x512xf32>
    %14 = tpu.matmul %13, %5, %cst {dimension_numbers = #tpu.dot_dimension_numbers<[1], [0], [0], [1], [0, 0, 1, 1], [], []>} : vector<8x160xf32>, vector<160x512xf32>, vector<8x512xf32> -> vector<8x512xf32>
    %15 = arith.addf %14, %4 : vector<8x512xf32>
    %16 = vector.extract_strided_slice %15 {offsets = [0, 0], sizes = [8, 128], strides = [1, 1]} : vector<8x512xf32> to vector<8x128xf32>
    %17 = arith.negf %16 : vector<8x128xf32>
    %18 = math.exp %17 : vector<8x128xf32>
    %cst_12 = arith.constant 1.000000e+00 : f32
    %19 = vector.broadcast %cst_12 : f32 to vector<8x128xf32>
    %20 = arith.addf %19, %18 : vector<8x128xf32>
    %21 = arith.divf %19, %20 : vector<8x128xf32>
    %22 = vector.extract_strided_slice %15 {offsets = [0, 128], sizes = [8, 128], strides = [1, 1]} : vector<8x512xf32> to vector<8x128xf32>
    %23 = arith.negf %22 : vector<8x128xf32>
    %24 = math.exp %23 : vector<8x128xf32>
    %cst_13 = arith.constant 1.000000e+00 : f32
    %25 = vector.broadcast %cst_13 : f32 to vector<8x128xf32>
    %26 = arith.addf %25, %24 : vector<8x128xf32>
    %27 = arith.divf %25, %26 : vector<8x128xf32>
    %28 = vector.extract_strided_slice %15 {offsets = [0, 256], sizes = [8, 128], strides = [1, 1]} : vector<8x512xf32> to vector<8x128xf32>
    %29 = math.tanh %28 : vector<8x128xf32>
    %30 = vector.extract_strided_slice %15 {offsets = [0, 384], sizes = [8, 128], strides = [1, 1]} : vector<8x512xf32> to vector<8x128xf32>
    %31 = arith.negf %30 : vector<8x128xf32>
    %32 = math.exp %31 : vector<8x128xf32>
    %cst_14 = arith.constant 1.000000e+00 : f32
    %33 = vector.broadcast %cst_14 : f32 to vector<8x128xf32>
    %34 = arith.addf %33, %32 : vector<8x128xf32>
    %35 = arith.divf %33, %34 : vector<8x128xf32>
    %36 = arith.mulf %27, %7 : vector<8x128xf32>
    %37 = arith.mulf %21, %29 : vector<8x128xf32>
    %38 = arith.addf %36, %37 : vector<8x128xf32>
    %39 = math.tanh %38 : vector<8x128xf32>
    %40 = arith.mulf %35, %39 : vector<8x128xf32>
    %41 = arith.index_cast %9 : i32 to index
    %c0_15 = arith.constant 0 : index
    %42 = vector.load %arg12[%41, %c0_15] : memref<64x128xf32, #tpu.memory_space<vmem>>, vector<8x128xf32>
    tpu.vector_store %arg12[%41, %c0_15], %40 {strides = array<i32>} : memref<64x128xf32, #tpu.memory_space<vmem>>, vector<8x128xf32>,
    %c1_i32 = arith.constant 1 : i32
    %c8_i32_16 = arith.constant 8 : i32
    %43 = arith.muli %c1_i32, %c8_i32_16 : i32
    %44 = tpu.assume_multiple %43, 8 : i32
    %45 = arith.index_cast %44 : i32 to index
    %c0_17 = arith.constant 0 : index
    %46 = vector.load %arg11[%45, %c0_17] : memref<64x160xf32, #tpu.memory_space<vmem>>, vector<8x128xf32>
    tpu.vector_store %arg11[%45, %c0_17], %40 {strides = array<i32>} : memref<64x160xf32, #tpu.memory_space<vmem>>, vector<8x128xf32>,
    %47 = arith.index_cast %44 : i32 to index
    %c0_18 = arith.constant 0 : index
    %48 = vector.load %arg11[%47, %c0_18] : memref<64x160xf32, #tpu.memory_space<vmem>>, vector<8x160xf32>
    %cst_19 = arith.constant dense<0.000000e+00> : vector<8x512xf32>
    %49 = tpu.matmul %48, %5, %cst_19 {dimension_numbers = #tpu.dot_dimension_numbers<[1], [0], [0], [1], [0, 0, 1, 1], [], []>} : vector<8x160xf32>, vector<160x512xf32>, vector<8x512xf32> -> vector<8x512xf32>
    %50 = arith.addf %49, %4 : vector<8x512xf32>
    %51 = vector.extract_strided_slice %50 {offsets = [0, 0], sizes = [8, 128], strides = [1, 1]} : vector<8x512xf32> to vector<8x128xf32>
    %52 = arith.negf %51 : vector<8x128xf32>
    %53 = math.exp %52 : vector<8x128xf32>
    %cst_20 = arith.constant 1.000000e+00 : f32
    %54 = vector.broadcast %cst_20 : f32 to vector<8x128xf32>
    %55 = arith.addf %54, %53 : vector<8x128xf32>
    %56 = arith.divf %54, %55 : vector<8x128xf32>
    %57 = vector.extract_strided_slice %50 {offsets = [0, 128], sizes = [8, 128], strides = [1, 1]} : vector<8x512xf32> to vector<8x128xf32>
    %58 = arith.negf %57 : vector<8x128xf32>
    %59 = math.exp %58 : vector<8x128xf32>
    %cst_21 = arith.constant 1.000000e+00 : f32
    %60 = vector.broadcast %cst_21 : f32 to vector<8x128xf32>
    %61 = arith.addf %60, %59 : vector<8x128xf32>
    %62 = arith.divf %60, %61 : vector<8x128xf32>
    %63 = vector.extract_strided_slice %50 {offsets = [0, 256], sizes = [8, 128], strides = [1, 1]} : vector<8x512xf32> to vector<8x128xf32>
    %64 = math.tanh %63 : vector<8x128xf32>
    %65 = vector.extract_strided_slice %50 {offsets = [0, 384], sizes = [8, 128], strides = [1, 1]} : vector<8x512xf32> to vector<8x128xf32>
    %66 = arith.negf %65 : vector<8x128xf32>
    %67 = math.exp %66 : vector<8x128xf32>
    %cst_22 = arith.constant 1.000000e+00 : f32
    %68 = vector.broadcast %cst_22 : f32 to vector<8x128xf32>
    %69 = arith.addf %68, %67 : vector<8x128xf32>
    %70 = arith.divf %68, %69 : vector<8x128xf32>
    %71 = arith.mulf %62, %38 : vector<8x128xf32>
    %72 = arith.mulf %56, %64 : vector<8x128xf32>
    %73 = arith.addf %71, %72 : vector<8x128xf32>
    %74 = math.tanh %73 : vector<8x128xf32>
    %75 = arith.mulf %70, %74 : vector<8x128xf32>
    %76 = arith.index_cast %44 : i32 to index
    %c0_23 = arith.constant 0 : index
    %77 = vector.load %arg12[%76, %c0_23] : memref<64x128xf32, #tpu.memory_space<vmem>>, vector<8x128xf32>
    tpu.vector_store %arg12[%76, %c0_23], %75 {strides = array<i32>} : memref<64x128xf32, #tpu.memory_space<vmem>>, vector<8x128xf32>,
    %c2_i32 = arith.constant 2 : i32
    %c8_i32_24 = arith.constant 8 : i32
    %78 = arith.muli %c2_i32, %c8_i32_24 : i32
    %79 = tpu.assume_multiple %78, 8 : i32
    %80 = arith.index_cast %79 : i32 to index
    %c0_25 = arith.constant 0 : index
    %81 = vector.load %arg11[%80, %c0_25] : memref<64x160xf32, #tpu.memory_space<vmem>>, vector<8x128xf32>
    tpu.vector_store %arg11[%80, %c0_25], %75 {strides = array<i32>} : memref<64x160xf32, #tpu.memory_space<vmem>>, vector<8x128xf32>,
    %82 = arith.index_cast %79 : i32 to index
    %c0_26 = arith.constant 0 : index
    %83 = vector.load %arg11[%82, %c0_26] : memref<64x160xf32, #tpu.memory_space<vmem>>, vector<8x160xf32>
    %cst_27 = arith.constant dense<0.000000e+00> : vector<8x512xf32>
    %84 = tpu.matmul %83, %5, %cst_27 {dimension_numbers = #tpu.dot_dimension_numbers<[1], [0], [0], [1], [0, 0, 1, 1], [], []>} : vector<8x160xf32>, vector<160x512xf32>, vector<8x512xf32> -> vector<8x512xf32>
    %85 = arith.addf %84, %4 : vector<8x512xf32>
    %86 = vector.extract_strided_slice %85 {offsets = [0, 0], sizes = [8, 128], strides = [1, 1]} : vector<8x512xf32> to vector<8x128xf32>
    %87 = arith.negf %86 : vector<8x128xf32>
    %88 = math.exp %87 : vector<8x128xf32>
    %cst_28 = arith.constant 1.000000e+00 : f32
    %89 = vector.broadcast %cst_28 : f32 to vector<8x128xf32>
    %90 = arith.addf %89, %88 : vector<8x128xf32>
    %91 = arith.divf %89, %90 : vector<8x128xf32>
    %92 = vector.extract_strided_slice %85 {offsets = [0, 128], sizes = [8, 128], strides = [1, 1]} : vector<8x512xf32> to vector<8x128xf32>
    %93 = arith.negf %92 : vector<8x128xf32>
    %94 = math.exp %93 : vector<8x128xf32>
    %cst_29 = arith.constant 1.000000e+00 : f32
    %95 = vector.broadcast %cst_29 : f32 to vector<8x128xf32>
    %96 = arith.addf %95, %94 : vector<8x128xf32>
    %97 = arith.divf %95, %96 : vector<8x128xf32>
    %98 = vector.extract_strided_slice %85 {offsets = [0, 256], sizes = [8, 128], strides = [1, 1]} : vector<8x512xf32> to vector<8x128xf32>
    %99 = math.tanh %98 : vector<8x128xf32>
    %100 = vector.extract_strided_slice %85 {offsets = [0, 384], sizes = [8, 128], strides = [1, 1]} : vector<8x512xf32> to vector<8x128xf32>
    %101 = arith.negf %100 : vector<8x128xf32>
    %102 = math.exp %101 : vector<8x128xf32>
    %cst_30 = arith.constant 1.000000e+00 : f32
    %103 = vector.broadcast %cst_30 : f32 to vector<8x128xf32>
    %104 = arith.addf %103, %102 : vector<8x128xf32>
    %105 = arith.divf %103, %104 : vector<8x128xf32>
    %106 = arith.mulf %97, %73 : vector<8x128xf32>
    %107 = arith.mulf %91, %99 : vector<8x128xf32>
    %108 = arith.addf %106, %107 : vector<8x128xf32>
    %109 = math.tanh %108 : vector<8x128xf32>
    %110 = arith.mulf %105, %109 : vector<8x128xf32>
    %111 = arith.index_cast %79 : i32 to index
    %c0_31 = arith.constant 0 : index
    %112 = vector.load %arg12[%111, %c0_31] : memref<64x128xf32, #tpu.memory_space<vmem>>, vector<8x128xf32>
    tpu.vector_store %arg12[%111, %c0_31], %110 {strides = array<i32>} : memref<64x128xf32, #tpu.memory_space<vmem>>, vector<8x128xf32>,
    %c3_i32 = arith.constant 3 : i32
    %c8_i32_32 = arith.constant 8 : i32
    %113 = arith.muli %c3_i32, %c8_i32_32 : i32
    %114 = tpu.assume_multiple %113, 8 : i32
    %115 = arith.index_cast %114 : i32 to index
    %c0_33 = arith.constant 0 : index
    %116 = vector.load %arg11[%115, %c0_33] : memref<64x160xf32, #tpu.memory_space<vmem>>, vector<8x128xf32>
    tpu.vector_store %arg11[%115, %c0_33], %110 {strides = array<i32>} : memref<64x160xf32, #tpu.memory_space<vmem>>, vector<8x128xf32>,
    %117 = arith.index_cast %114 : i32 to index
    %c0_34 = arith.constant 0 : index
    %118 = vector.load %arg11[%117, %c0_34] : memref<64x160xf32, #tpu.memory_space<vmem>>, vector<8x160xf32>
    %cst_35 = arith.constant dense<0.000000e+00> : vector<8x512xf32>
    %119 = tpu.matmul %118, %5, %cst_35 {dimension_numbers = #tpu.dot_dimension_numbers<[1], [0], [0], [1], [0, 0, 1, 1], [], []>} : vector<8x160xf32>, vector<160x512xf32>, vector<8x512xf32> -> vector<8x512xf32>
    %120 = arith.addf %119, %4 : vector<8x512xf32>
    %121 = vector.extract_strided_slice %120 {offsets = [0, 0], sizes = [8, 128], strides = [1, 1]} : vector<8x512xf32> to vector<8x128xf32>
    %122 = arith.negf %121 : vector<8x128xf32>
    %123 = math.exp %122 : vector<8x128xf32>
    %cst_36 = arith.constant 1.000000e+00 : f32
    %124 = vector.broadcast %cst_36 : f32 to vector<8x128xf32>
    %125 = arith.addf %124, %123 : vector<8x128xf32>
    %126 = arith.divf %124, %125 : vector<8x128xf32>
    %127 = vector.extract_strided_slice %120 {offsets = [0, 128], sizes = [8, 128], strides = [1, 1]} : vector<8x512xf32> to vector<8x128xf32>
    %128 = arith.negf %127 : vector<8x128xf32>
    %129 = math.exp %128 : vector<8x128xf32>
    %cst_37 = arith.constant 1.000000e+00 : f32
    %130 = vector.broadcast %cst_37 : f32 to vector<8x128xf32>
    %131 = arith.addf %130, %129 : vector<8x128xf32>
    %132 = arith.divf %130, %131 : vector<8x128xf32>
    %133 = vector.extract_strided_slice %120 {offsets = [0, 256], sizes = [8, 128], strides = [1, 1]} : vector<8x512xf32> to vector<8x128xf32>
    %134 = math.tanh %133 : vector<8x128xf32>
    %135 = vector.extract_strided_slice %120 {offsets = [0, 384], sizes = [8, 128], strides = [1, 1]} : vector<8x512xf32> to vector<8x128xf32>
    %136 = arith.negf %135 : vector<8x128xf32>
    %137 = math.exp %136 : vector<8x128xf32>
    %cst_38 = arith.constant 1.000000e+00 : f32
    %138 = vector.broadcast %cst_38 : f32 to vector<8x128xf32>
    %139 = arith.addf %138, %137 : vector<8x128xf32>
    %140 = arith.divf %138, %139 : vector<8x128xf32>
    %141 = arith.mulf %132, %108 : vector<8x128xf32>
    %142 = arith.mulf %126, %134 : vector<8x128xf32>
    %143 = arith.addf %141, %142 : vector<8x128xf32>
    %144 = math.tanh %143 : vector<8x128xf32>
    %145 = arith.mulf %140, %144 : vector<8x128xf32>
    %146 = arith.index_cast %114 : i32 to index
    %c0_39 = arith.constant 0 : index
    %147 = vector.load %arg12[%146, %c0_39] : memref<64x128xf32, #tpu.memory_space<vmem>>, vector<8x128xf32>
    tpu.vector_store %arg12[%146, %c0_39], %145 {strides = array<i32>} : memref<64x128xf32, #tpu.memory_space<vmem>>, vector<8x128xf32>,
    %c4_i32 = arith.constant 4 : i32
    %c8_i32_40 = arith.constant 8 : i32
    %148 = arith.muli %c4_i32, %c8_i32_40 : i32
    %149 = tpu.assume_multiple %148, 8 : i32
    %150 = arith.index_cast %149 : i32 to index
    %c0_41 = arith.constant 0 : index
    %151 = vector.load %arg11[%150, %c0_41] : memref<64x160xf32, #tpu.memory_space<vmem>>, vector<8x128xf32>
    tpu.vector_store %arg11[%150, %c0_41], %145 {strides = array<i32>} : memref<64x160xf32, #tpu.memory_space<vmem>>, vector<8x128xf32>,
    %152 = arith.index_cast %149 : i32 to index
    %c0_42 = arith.constant 0 : index
    %153 = vector.load %arg11[%152, %c0_42] : memref<64x160xf32, #tpu.memory_space<vmem>>, vector<8x160xf32>
    %cst_43 = arith.constant dense<0.000000e+00> : vector<8x512xf32>
    %154 = tpu.matmul %153, %5, %cst_43 {dimension_numbers = #tpu.dot_dimension_numbers<[1], [0], [0], [1], [0, 0, 1, 1], [], []>} : vector<8x160xf32>, vector<160x512xf32>, vector<8x512xf32> -> vector<8x512xf32>
    %155 = arith.addf %154, %4 : vector<8x512xf32>
    %156 = vector.extract_strided_slice %155 {offsets = [0, 0], sizes = [8, 128], strides = [1, 1]} : vector<8x512xf32> to vector<8x128xf32>
    %157 = arith.negf %156 : vector<8x128xf32>
    %158 = math.exp %157 : vector<8x128xf32>
    %cst_44 = arith.constant 1.000000e+00 : f32
    %159 = vector.broadcast %cst_44 : f32 to vector<8x128xf32>
    %160 = arith.addf %159, %158 : vector<8x128xf32>
    %161 = arith.divf %159, %160 : vector<8x128xf32>
    %162 = vector.extract_strided_slice %155 {offsets = [0, 128], sizes = [8, 128], strides = [1, 1]} : vector<8x512xf32> to vector<8x128xf32>
    %163 = arith.negf %162 : vector<8x128xf32>
    %164 = math.exp %163 : vector<8x128xf32>
    %cst_45 = arith.constant 1.000000e+00 : f32
    %165 = vector.broadcast %cst_45 : f32 to vector<8x128xf32>
    %166 = arith.addf %165, %164 : vector<8x128xf32>
    %167 = arith.divf %165, %166 : vector<8x128xf32>
    %168 = vector.extract_strided_slice %155 {offsets = [0, 256], sizes = [8, 128], strides = [1, 1]} : vector<8x512xf32> to vector<8x128xf32>
    %169 = math.tanh %168 : vector<8x128xf32>
    %170 = vector.extract_strided_slice %155 {offsets = [0, 384], sizes = [8, 128], strides = [1, 1]} : vector<8x512xf32> to vector<8x128xf32>
    %171 = arith.negf %170 : vector<8x128xf32>
    %172 = math.exp %171 : vector<8x128xf32>
    %cst_46 = arith.constant 1.000000e+00 : f32
    %173 = vector.broadcast %cst_46 : f32 to vector<8x128xf32>
    %174 = arith.addf %173, %172 : vector<8x128xf32>
    %175 = arith.divf %173, %174 : vector<8x128xf32>
    %176 = arith.mulf %167, %143 : vector<8x128xf32>
    %177 = arith.mulf %161, %169 : vector<8x128xf32>
    %178 = arith.addf %176, %177 : vector<8x128xf32>
    %179 = math.tanh %178 : vector<8x128xf32>
    %180 = arith.mulf %175, %179 : vector<8x128xf32>
    %181 = arith.index_cast %149 : i32 to index
    %c0_47 = arith.constant 0 : index
    %182 = vector.load %arg12[%181, %c0_47] : memref<64x128xf32, #tpu.memory_space<vmem>>, vector<8x128xf32>
    tpu.vector_store %arg12[%181, %c0_47], %180 {strides = array<i32>} : memref<64x128xf32, #tpu.memory_space<vmem>>, vector<8x128xf32>,
    %c5_i32 = arith.constant 5 : i32
    %c8_i32_48 = arith.constant 8 : i32
    %183 = arith.muli %c5_i32, %c8_i32_48 : i32
    %184 = tpu.assume_multiple %183, 8 : i32
    %185 = arith.index_cast %184 : i32 to index
    %c0_49 = arith.constant 0 : index
    %186 = vector.load %arg11[%185, %c0_49] : memref<64x160xf32, #tpu.memory_space<vmem>>, vector<8x128xf32>
    tpu.vector_store %arg11[%185, %c0_49], %180 {strides = array<i32>} : memref<64x160xf32, #tpu.memory_space<vmem>>, vector<8x128xf32>,
    %187 = arith.index_cast %184 : i32 to index
    %c0_50 = arith.constant 0 : index
    %188 = vector.load %arg11[%187, %c0_50] : memref<64x160xf32, #tpu.memory_space<vmem>>, vector<8x160xf32>
    %cst_51 = arith.constant dense<0.000000e+00> : vector<8x512xf32>
    %189 = tpu.matmul %188, %5, %cst_51 {dimension_numbers = #tpu.dot_dimension_numbers<[1], [0], [0], [1], [0, 0, 1, 1], [], []>} : vector<8x160xf32>, vector<160x512xf32>, vector<8x512xf32> -> vector<8x512xf32>
    %190 = arith.addf %189, %4 : vector<8x512xf32>
    %191 = vector.extract_strided_slice %190 {offsets = [0, 0], sizes = [8, 128], strides = [1, 1]} : vector<8x512xf32> to vector<8x128xf32>
    %192 = arith.negf %191 : vector<8x128xf32>
    %193 = math.exp %192 : vector<8x128xf32>
    %cst_52 = arith.constant 1.000000e+00 : f32
    %194 = vector.broadcast %cst_52 : f32 to vector<8x128xf32>
    %195 = arith.addf %194, %193 : vector<8x128xf32>
    %196 = arith.divf %194, %195 : vector<8x128xf32>
    %197 = vector.extract_strided_slice %190 {offsets = [0, 128], sizes = [8, 128], strides = [1, 1]} : vector<8x512xf32> to vector<8x128xf32>
    %198 = arith.negf %197 : vector<8x128xf32>
    %199 = math.exp %198 : vector<8x128xf32>
    %cst_53 = arith.constant 1.000000e+00 : f32
    %200 = vector.broadcast %cst_53 : f32 to vector<8x128xf32>
    %201 = arith.addf %200, %199 : vector<8x128xf32>
    %202 = arith.divf %200, %201 : vector<8x128xf32>
    %203 = vector.extract_strided_slice %190 {offsets = [0, 256], sizes = [8, 128], strides = [1, 1]} : vector<8x512xf32> to vector<8x128xf32>
    %204 = math.tanh %203 : vector<8x128xf32>
    %205 = vector.extract_strided_slice %190 {offsets = [0, 384], sizes = [8, 128], strides = [1, 1]} : vector<8x512xf32> to vector<8x128xf32>
    %206 = arith.negf %205 : vector<8x128xf32>
    %207 = math.exp %206 : vector<8x128xf32>
    %cst_54 = arith.constant 1.000000e+00 : f32
    %208 = vector.broadcast %cst_54 : f32 to vector<8x128xf32>
    %209 = arith.addf %208, %207 : vector<8x128xf32>
    %210 = arith.divf %208, %209 : vector<8x128xf32>
    %211 = arith.mulf %202, %178 : vector<8x128xf32>
    %212 = arith.mulf %196, %204 : vector<8x128xf32>
    %213 = arith.addf %211, %212 : vector<8x128xf32>
    %214 = math.tanh %213 : vector<8x128xf32>
    %215 = arith.mulf %210, %214 : vector<8x128xf32>
    %216 = arith.index_cast %184 : i32 to index
    %c0_55 = arith.constant 0 : index
    %217 = vector.load %arg12[%216, %c0_55] : memref<64x128xf32, #tpu.memory_space<vmem>>, vector<8x128xf32>
    tpu.vector_store %arg12[%216, %c0_55], %215 {strides = array<i32>} : memref<64x128xf32, #tpu.memory_space<vmem>>, vector<8x128xf32>,
    %c6_i32 = arith.constant 6 : i32
    %c8_i32_56 = arith.constant 8 : i32
    %218 = arith.muli %c6_i32, %c8_i32_56 : i32
    %219 = tpu.assume_multiple %218, 8 : i32
    %220 = arith.index_cast %219 : i32 to index
    %c0_57 = arith.constant 0 : index
    %221 = vector.load %arg11[%220, %c0_57] : memref<64x160xf32, #tpu.memory_space<vmem>>, vector<8x128xf32>
    tpu.vector_store %arg11[%220, %c0_57], %215 {strides = array<i32>} : memref<64x160xf32, #tpu.memory_space<vmem>>, vector<8x128xf32>,
    %222 = arith.index_cast %219 : i32 to index
    %c0_58 = arith.constant 0 : index
    %223 = vector.load %arg11[%222, %c0_58] : memref<64x160xf32, #tpu.memory_space<vmem>>, vector<8x160xf32>
    %cst_59 = arith.constant dense<0.000000e+00> : vector<8x512xf32>
    %224 = tpu.matmul %223, %5, %cst_59 {dimension_numbers = #tpu.dot_dimension_numbers<[1], [0], [0], [1], [0, 0, 1, 1], [], []>} : vector<8x160xf32>, vector<160x512xf32>, vector<8x512xf32> -> vector<8x512xf32>
    %225 = arith.addf %224, %4 : vector<8x512xf32>
    %226 = vector.extract_strided_slice %225 {offsets = [0, 0], sizes = [8, 128], strides = [1, 1]} : vector<8x512xf32> to vector<8x128xf32>
    %227 = arith.negf %226 : vector<8x128xf32>
    %228 = math.exp %227 : vector<8x128xf32>
    %cst_60 = arith.constant 1.000000e+00 : f32
    %229 = vector.broadcast %cst_60 : f32 to vector<8x128xf32>
    %230 = arith.addf %229, %228 : vector<8x128xf32>
    %231 = arith.divf %229, %230 : vector<8x128xf32>
    %232 = vector.extract_strided_slice %225 {offsets = [0, 128], sizes = [8, 128], strides = [1, 1]} : vector<8x512xf32> to vector<8x128xf32>
    %233 = arith.negf %232 : vector<8x128xf32>
    %234 = math.exp %233 : vector<8x128xf32>
    %cst_61 = arith.constant 1.000000e+00 : f32
    %235 = vector.broadcast %cst_61 : f32 to vector<8x128xf32>
    %236 = arith.addf %235, %234 : vector<8x128xf32>
    %237 = arith.divf %235, %236 : vector<8x128xf32>
    %238 = vector.extract_strided_slice %225 {offsets = [0, 256], sizes = [8, 128], strides = [1, 1]} : vector<8x512xf32> to vector<8x128xf32>
    %239 = math.tanh %238 : vector<8x128xf32>
    %240 = vector.extract_strided_slice %225 {offsets = [0, 384], sizes = [8, 128], strides = [1, 1]} : vector<8x512xf32> to vector<8x128xf32>
    %241 = arith.negf %240 : vector<8x128xf32>
    %242 = math.exp %241 : vector<8x128xf32>
    %cst_62 = arith.constant 1.000000e+00 : f32
    %243 = vector.broadcast %cst_62 : f32 to vector<8x128xf32>
    %244 = arith.addf %243, %242 : vector<8x128xf32>
    %245 = arith.divf %243, %244 : vector<8x128xf32>
    %246 = arith.mulf %237, %213 : vector<8x128xf32>
    %247 = arith.mulf %231, %239 : vector<8x128xf32>
    %248 = arith.addf %246, %247 : vector<8x128xf32>
    %249 = math.tanh %248 : vector<8x128xf32>
    %250 = arith.mulf %245, %249 : vector<8x128xf32>
    %251 = arith.index_cast %219 : i32 to index
    %c0_63 = arith.constant 0 : index
    %252 = vector.load %arg12[%251, %c0_63] : memref<64x128xf32, #tpu.memory_space<vmem>>, vector<8x128xf32>
    tpu.vector_store %arg12[%251, %c0_63], %250 {strides = array<i32>} : memref<64x128xf32, #tpu.memory_space<vmem>>, vector<8x128xf32>,
    %c7_i32 = arith.constant 7 : i32
    %c8_i32_64 = arith.constant 8 : i32
    %253 = arith.muli %c7_i32, %c8_i32_64 : i32
    %254 = tpu.assume_multiple %253, 8 : i32
    %255 = arith.index_cast %254 : i32 to index
    %c0_65 = arith.constant 0 : index
    %256 = vector.load %arg11[%255, %c0_65] : memref<64x160xf32, #tpu.memory_space<vmem>>, vector<8x128xf32>
    tpu.vector_store %arg11[%255, %c0_65], %250 {strides = array<i32>} : memref<64x160xf32, #tpu.memory_space<vmem>>, vector<8x128xf32>,
    %257 = arith.index_cast %254 : i32 to index
    %c0_66 = arith.constant 0 : index
    %258 = vector.load %arg11[%257, %c0_66] : memref<64x160xf32, #tpu.memory_space<vmem>>, vector<8x160xf32>
    %cst_67 = arith.constant dense<0.000000e+00> : vector<8x512xf32>
    %259 = tpu.matmul %258, %5, %cst_67 {dimension_numbers = #tpu.dot_dimension_numbers<[1], [0], [0], [1], [0, 0, 1, 1], [], []>} : vector<8x160xf32>, vector<160x512xf32>, vector<8x512xf32> -> vector<8x512xf32>
    %260 = arith.addf %259, %4 : vector<8x512xf32>
    %261 = vector.extract_strided_slice %260 {offsets = [0, 0], sizes = [8, 128], strides = [1, 1]} : vector<8x512xf32> to vector<8x128xf32>
    %262 = arith.negf %261 : vector<8x128xf32>
    %263 = math.exp %262 : vector<8x128xf32>
    %cst_68 = arith.constant 1.000000e+00 : f32
    %264 = vector.broadcast %cst_68 : f32 to vector<8x128xf32>
    %265 = arith.addf %264, %263 : vector<8x128xf32>
    %266 = arith.divf %264, %265 : vector<8x128xf32>
    %267 = vector.extract_strided_slice %260 {offsets = [0, 128], sizes = [8, 128], strides = [1, 1]} : vector<8x512xf32> to vector<8x128xf32>
    %268 = arith.negf %267 : vector<8x128xf32>
    %269 = math.exp %268 : vector<8x128xf32>
    %cst_69 = arith.constant 1.000000e+00 : f32
    %270 = vector.broadcast %cst_69 : f32 to vector<8x128xf32>
    %271 = arith.addf %270, %269 : vector<8x128xf32>
    %272 = arith.divf %270, %271 : vector<8x128xf32>
    %273 = vector.extract_strided_slice %260 {offsets = [0, 256], sizes = [8, 128], strides = [1, 1]} : vector<8x512xf32> to vector<8x128xf32>
    %274 = math.tanh %273 : vector<8x128xf32>
    %275 = vector.extract_strided_slice %260 {offsets = [0, 384], sizes = [8, 128], strides = [1, 1]} : vector<8x512xf32> to vector<8x128xf32>
    %276 = arith.negf %275 : vector<8x128xf32>
    %277 = math.exp %276 : vector<8x128xf32>
    %cst_70 = arith.constant 1.000000e+00 : f32
    %278 = vector.broadcast %cst_70 : f32 to vector<8x128xf32>
    %279 = arith.addf %278, %277 : vector<8x128xf32>
    %280 = arith.divf %278, %279 : vector<8x128xf32>
    %281 = arith.mulf %272, %248 : vector<8x128xf32>
    %282 = arith.mulf %266, %274 : vector<8x128xf32>
    %283 = arith.addf %281, %282 : vector<8x128xf32>
    %284 = math.tanh %283 : vector<8x128xf32>
    %285 = arith.mulf %280, %284 : vector<8x128xf32>
    %286 = arith.index_cast %254 : i32 to index
    %c0_71 = arith.constant 0 : index
    %287 = vector.load %arg12[%286, %c0_71] : memref<64x128xf32, #tpu.memory_space<vmem>>, vector<8x128xf32>
    tpu.vector_store %arg12[%286, %c0_71], %285 {strides = array<i32>} : memref<64x128xf32, #tpu.memory_space<vmem>>, vector<8x128xf32>,
    %c8_i32_72 = arith.constant 8 : i32
    %c0_73 = arith.constant 0 : index
    %c0_74 = arith.constant 0 : index
    %288 = vector.load %arg12[%c0_73, %c0_74] : memref<64x128xf32, #tpu.memory_space<vmem>>, vector<64x128xf32>
    %c0_75 = arith.constant 0 : index
    %c0_76 = arith.constant 0 : index
    %289 = vector.load %arg4[%c0_75, %c0_76] : memref<128x128xf32, #tpu.memory_space<vmem>>, vector<128x128xf32>
    %cst_77 = arith.constant dense<0.000000e+00> : vector<64x128xf32>
    %290 = tpu.matmul %288, %289, %cst_77 {dimension_numbers = #tpu.dot_dimension_numbers<[1], [0], [0], [1], [0, 0, 1, 1], [], []>} : vector<64x128xf32>, vector<128x128xf32>, vector<64x128xf32> -> vector<64x128xf32>
    %c0_78 = arith.constant 0 : index
    %c0_79 = arith.constant 0 : index
    %291 = vector.load %arg5[%c0_78, %c0_79] : memref<1x128xf32, #tpu.memory_space<vmem>>, vector<1x128xf32>
    %292 = vector.broadcast %291 : vector<1x128xf32> to vector<64x128xf32>
    %293 = arith.addf %290, %292 : vector<64x128xf32>
    %c0_80 = arith.constant 0 : index
    %c0_81 = arith.constant 0 : index
    %294 = vector.load %arg8[%c0_80, %c0_81] : memref<64x128xf32, #tpu.memory_space<vmem>>, vector<64x128xf32>
    tpu.vector_store %arg8[%c0_80, %c0_81], %293 {strides = array<i32>} : memref<64x128xf32, #tpu.memory_space<vmem>>, vector<64x128xf32>,
    %c0_82 = arith.constant 0 : index
    %c0_83 = arith.constant 0 : index
    %295 = vector.load %arg9[%c0_82, %c0_83] : memref<8x128xf32, #tpu.memory_space<vmem>>, vector<8x128xf32>
    tpu.vector_store %arg9[%c0_82, %c0_83], %285 {strides = array<i32>} : memref<8x128xf32, #tpu.memory_space<vmem>>, vector<8x128xf32>,
    %c0_84 = arith.constant 0 : index
    %c0_85 = arith.constant 0 : index
    %296 = vector.load %arg10[%c0_84, %c0_85] : memref<8x128xf32, #tpu.memory_space<vmem>>, vector<8x128xf32>
    tpu.vector_store %arg10[%c0_84, %c0_85], %283 {strides = array<i32>} : memref<8x128xf32, #tpu.memory_space<vmem>>, vector<8x128xf32>,
    return
  }
  func.func @transform_0(%arg0: i32) -> (i32, i32) {
    %c0_i32 = arith.constant 0 : i32
    %c0_i32_0 = arith.constant 0 : i32
    %c0_i32_1 = arith.constant 0 : i32
    return %c0_i32, %c0_i32_0 : i32, i32
  }
  func.func @transform_1(%arg0: i32) -> (i32, i32) {
    %c0_i32 = arith.constant 0 : i32
    %c0_i32_0 = arith.constant 0 : i32
    %c0_i32_1 = arith.constant 0 : i32
    return %c0_i32, %c0_i32_0 : i32, i32
  }
  func.func @transform_2(%arg0: i32) -> (i32, i32) {
    %c0_i32 = arith.constant 0 : i32
    %c0_i32_0 = arith.constant 0 : i32
    %c0_i32_1 = arith.constant 0 : i32
    return %c0_i32, %c0_i32_0 : i32, i32
  }
  func.func @transform_3(%arg0: i32) -> (i32, i32) {
    %c0_i32 = arith.constant 0 : i32
    %c0_i32_0 = arith.constant 0 : i32
    %c0_i32_1 = arith.constant 0 : i32
    return %c0_i32, %c0_i32_0 : i32, i32
  }
  func.func @transform_4(%arg0: i32) -> (i32, i32) {
    %c0_i32 = arith.constant 0 : i32
    %c0_i32_0 = arith.constant 0 : i32
    %c0_i32_1 = arith.constant 0 : i32
    return %c0_i32, %c0_i32_0 : i32, i32
  }
  func.func @transform_5(%arg0: i32) -> (i32, i32) {
    %c0_i32 = arith.constant 0 : i32
    %c0_i32_0 = arith.constant 0 : i32
    %c0_i32_1 = arith.constant 0 : i32
    return %c0_i32, %c0_i32_0 : i32, i32
  }
  func.func @transform_6(%arg0: i32) -> (i32, i32) {
    %c0_i32 = arith.constant 0 : i32
    %c0_i32_0 = arith.constant 0 : i32
    %c0_i32_1 = arith.constant 0 : i32
    return %c0_i32, %c0_i32_0 : i32, i32
  }
  func.func @transform_7(%arg0: i32) -> (i32, i32) {
    %c0_i32 = arith.constant 0 : i32
    %c0_i32_0 = arith.constant 0 : i32
    %c0_i32_1 = arith.constant 0 : i32
    return %c0_i32, %c0_i32_0 : i32, i32
  }
  func.func @transform_8(%arg0: i32) -> (i32, i32) {
    %c0_i32 = arith.constant 0 : i32
    %c0_i32_0 = arith.constant 0 : i32
    %c0_i32_1 = arith.constant 0 : i32
    return %c0_i32, %c0_i32_0 : i32, i32
  }
  func.func @transform_9(%arg0: i32) -> (i32, i32) {
    %c0_i32 = arith.constant 0 : i32
    %c0_i32_0 = arith.constant 0 : i32
    %c0_i32_1 = arith.constant 0 : i32
    return %c0_i32, %c0_i32_0 : i32, i32
  }
}

</mosaic_0001>

<bundles_post_ra>
// kernel: tpu_custom_call.1
= control target key start
LH: loop header
LB: loop body
LE: loop exit
PB: predicated region body
PF: predicated region fallthrough
CT: control target
= control target key end

     0   :  { %15 = vsyncpa [#allocation5], 0  ;;  %s3542_s0 = inlined_call_operand.vmem [shape: f32[64,32], index: 0, kind: input, shape index: {}]   ;;  %s3543_s1 = inlined_call_operand.hbm [shape: f32[160,512], index: 1, kind: input, shape index: {}]   ;;  %s3544_s2 = inlined_call_operand.vmem [shape: f32[1,512], index: 2, kind: input, shape index: {}]   ;;  %s3545_s3 = inlined_call_operand.hbm [shape: f32[128,128], index: 3, kind: input, shape index: {}]   ;;  %s3546_s4 = inlined_call_operand.vmem [shape: f32[1,128], index: 4, kind: input, shape index: {}]   ;;  %s3547_s5 = inlined_call_operand.vmem [shape: f32[8,128], index: 5, kind: input, shape index: {}]   ;;  %s3548_s6 = inlined_call_operand.vmem [shape: f32[8,128], index: 6, kind: input, shape index: {}]   ;;  %s3549_s7 = inlined_call_operand.hbm [shape: f32[64,128], index: 7, kind: output, shape index: {0}]   ;;  %s3550_s8 = inlined_call_operand.hbm [shape: f32[8,128], index: 8, kind: output, shape index: {1}]   ;;  %s3551_s9 = inlined_call_operand.hbm [shape: f32[8,128], index: 9, kind: output, shape index: {2}]  }
   0x1   :  { %16 = vsyncpa [#allocation8], 0 }
   0x2   :  { %17 = vsyncpa [#allocation6], 0 }
   0x3   :  { %18 = vsyncpa [#allocation11], 0  ;;  %s2845_s30 = smov [#allocation4]   ;;  %s2727_s13 = scalar_lea.hbm %s3543_s1, 10240 }
   0x4   :  { %s26_s10 = sshll.u32 %s2845_s30, 4  ;;  %p2728_p0 = scmp.ne.s32.totalorder %s3543_s1, %s2727_s13  ;;  %s27_s10 = int_to_ptr.vmem [resolvable:$true] %s26_s10 }
   0x5   :  { %p2731_p1 = scmp.lt.u32.totalorder %s2727_s13, %s3543_s1 }
   0x7   :  { %p2733_p2 = pnand %p2731_p1, %p2728_p0 }
   0x9   :  { %2736 = shalt.err (!%p2733_p2)
}
   0xa   :  { %s2737_s18 = scalar_lea.vmem %s27_s10, 10240  ;;  %p2742_p4 = scmp.lt.s32.totalorder %s27_s10, %s27_s10 }
   0xb   :  { %p2738_p3 = scmp.ne.s32.totalorder %s27_s10, %s2737_s18  ;;  %p2743_p5 = scmp.lt.s32.totalorder %s2737_s18, %s2737_s18 }
   0xd   :  { %p2744_p6 = por %p2743_p5, %p2742_p4 }
   0xf   :  { %p2745_p7 = pnand %p2744_p6, %p2738_p3 }
  0x11   :  { %2748 = shalt.err (!%p2745_p7)
}
  0x12   :  { %s2846_s19 = smov 512   ;;  %s2847_s20 = smov 32  }
  0x13   :  { %32 = dma.hbm_to_vmem [thread:$0]  %s3543_s1, 10240, %s27_s10, [#allocation5], %s2846_s19, %s2846_s19, %s2847_s20  }
  0x14   :  { %s2848_s23 = smov [#allocation7]   ;;  %s2749_s27 = scalar_lea.hbm %s3545_s3, 2048 }
  0x15   :  { %s40_s24 = sshll.u32 %s2848_s23, 4  ;;  %p2750_p8 = scmp.ne.s32.totalorder %s3545_s3, %s2749_s27  ;;  %s41_s24 = int_to_ptr.vmem [resolvable:$true] %s40_s24 }
  0x16   :  { %p2753_p9 = scmp.lt.u32.totalorder %s2749_s27, %s3545_s3 }
  0x18   :  { %p2755_p10 = pnand %p2753_p9, %p2750_p8 }
  0x1a   :  { %2758 = shalt.err (!%p2755_p10)
}
  0x1b   :  { %s2759_s12 = scalar_lea.vmem %s41_s24, 2048  ;;  %p2764_p12 = scmp.lt.s32.totalorder %s41_s24, %s41_s24 }
  0x1c   :  { %p2760_p11 = scmp.ne.s32.totalorder %s41_s24, %s2759_s12  ;;  %p2765_p13 = scmp.lt.s32.totalorder %s2759_s12, %s2759_s12 }
  0x1e   :  { %p2766_p0 = por %p2765_p13, %p2764_p12 }
  0x20   :  { %p2767_p1 = pnand %p2766_p0, %p2760_p11 }
  0x22   :  { %2770 = shalt.err (!%p2767_p1)
}
  0x23   :  { %s2849_s1 = smov 128   ;;  %s2850_s10 = smov 8  }
  0x24   :  { %46 = dma.hbm_to_vmem [thread:$0]  %s3545_s3, 2048, %s41_s24, [#allocation8], %s2849_s1, %s2849_s1, %s2850_s10  }
  0x25   :  { %2837 = dma.done.wait [#allocation5], 10240  }
  0x26   :  { %2838 = vsyncadd [#allocation5], 4294957056 }
  0x27   :  { %2839 = dma.done.wait [#allocation8], 2048  }
  0x28   :  { %2840 = vsyncadd [#allocation8], 4294965248  ;;  %v99_v0 = vld [vmem:[#allocation4 + $0x8] sm:$0xff]  ;;  %v98_v2 = vld [vmem:[#allocation4] sm:$0xff]  ;;  %vm67_vm0 = vcmask 261120  }
  0x29   :  { %v103_v1 = vld [vmem:[#allocation4 + $0x28] sm:$0xff]  ;;  %v102_v4 = vld [vmem:[#allocation4 + $0x20] sm:$0xff]  ;;  %v101_v18 = vld [vmem:[#allocation4 + $0x18] sm:$0xff] }
  0x2a   :  { %v2931_v3 = vpack.c.bf16 %v103_v1, %v99_v0  ;;  %v107_v5 = vld [vmem:[#allocation4 + $0x48] sm:$0xff]  ;;  %v2933_v7 = vpack.c.bf16 %v102_v4, %v98_v2  ;;  %v106_v9 = vld [vmem:[#allocation4 + $0x40] sm:$0xff]  ;;  %v105_v19 = vld [vmem:[#allocation4 + $0x38] sm:$0xff] }
  0x2b   :  { %v111_v6 = vld [vmem:[#allocation4 + $0x68] sm:$0xff]  ;;  %v110_v10 = vld [vmem:[#allocation4 + $0x60] sm:$0xff]  ;;  %v2944_v21 = vpack.c.bf16 %v105_v19, %v101_v18  ;;  %v100_v22 = vld [vmem:[#allocation4 + $0x10] sm:$0xff] }
  0x2c   :  { %v2935_v8 = vpack.c.bf16 %v111_v6, %v107_v5  ;;  %v115_v11 = vld [vmem:[#allocation4 + $0x88] sm:$0xff]  ;;  %1903 = vmatprep.subr.bf16.mxu0 %v2931_v3  ;;  %v2939_v13 = vpack.c.bf16 %v110_v10, %v106_v9  ;;  %v114_v14 = vld [vmem:[#allocation4 + $0x80] sm:$0xff]  ;;  %v104_v23 = vld [vmem:[#allocation4 + $0x30] sm:$0xff] }
  0x2d   :  { %v119_v12 = vld [vmem:[#allocation4 + $0xa8] sm:$0xff]  ;;  %1905 = vmatpush1.bf16.msra.mxu0 %v2933_v7  ;;  %v118_v15 = vld [vmem:[#allocation4 + $0xa0] sm:$0xff]  ;;  %v2946_v24 = vpack.c.bf16 %v104_v23, %v100_v22  ;;  %1943 = vmatprep.subr.bf16.mxu1 %v2944_v21  ;;  %v109_v26 = vld [vmem:[#allocation4 + $0x58] sm:$0xff] }
  0x2e   :  { %1907 = vmatprep.subr.bf16.mxu0 %v2935_v8  ;;  %v2942_v16 = vpack.c.bf16 %v119_v12, %v115_v11  ;;  %v123_v17 = vld [vmem:[#allocation4 + $0xc8] sm:$0xff]  ;;  %v2949_v25 = vpack.c.bf16 %v118_v15, %v114_v14  ;;  %v113_v27 = vld [vmem:[#allocation4 + $0x78] sm:$0xff]  ;;  %v108_v28 = vld [vmem:[#allocation4 + $0x50] sm:$0xff] }
  0x2f   :  { %v127_v20 = vld [vmem:[#allocation4 + $0xe8] sm:$0xff]  ;;  %v122_v30 = vld [vmem:[#allocation4 + $0xc0] sm:$0xff]  ;;  %1945 = vmatpush1.bf16.msra.mxu1 %v2946_v24  ;;  %v2956_v32 = vpack.c.bf16 %v113_v27, %v109_v26  ;;  %v112_v33 = vld [vmem:[#allocation4 + $0x70] sm:$0xff] }
  0x30   :  { %v2953_v29 = vpack.c.bf16 %v127_v20, %v123_v17  ;;  %v126_v31 = vld [vmem:[#allocation4 + $0xe0] sm:$0xff]  ;;  %v131_v34 = vld [vmem:[#allocation4 + $0x108] sm:$0xff]  ;;  %v2958_v36 = vpack.c.bf16 %v112_v33, %v108_v28  ;;  %v117_v37 = vld [vmem:[#allocation4 + $0x98] sm:$0xff] }
  0x31   :  { %1909 = vmatpush1.bf16.msra.mxu0 %v2939_v13  ;;  %v135_v35 = vld [vmem:[#allocation4 + $0x128] sm:$0xff]  ;;  %1947 = vmatprep.subr.bf16.mxu1 %v2956_v32  ;;  %v121_v38 = vld [vmem:[#allocation4 + $0xb8] sm:$0xff]  ;;  %v116_v39 = vld [vmem:[#allocation4 + $0x90] sm:$0xff]  ;;  %v2962_v41 = vpack.c.bf16 %v126_v31, %v122_v30 }
  0x32   :  { %1911 = vmatprep.subr.bf16.mxu0 %v2942_v16  ;;  %v120_v40 = vld [vmem:[#allocation4 + $0xb0] sm:$0xff]  ;;  %v130_v42 = vld [vmem:[#allocation4 + $0x100] sm:$0xff]  ;;  %v2964_v44 = vpack.c.bf16 %v121_v38, %v117_v37  ;;  %v2967_v45 = vpack.c.bf16 %v135_v35, %v131_v34  ;;  %v139_v46 = vld [vmem:[#allocation4 + $0x148] sm:$0xff] }
  0x33   :  { %v134_v43 = vld [vmem:[#allocation4 + $0x120] sm:$0xff]  ;;  %1949 = vmatpush1.bf16.msra.mxu1 %v2958_v36  ;;  %v2970_v47 = vpack.c.bf16 %v120_v40, %v116_v39  ;;  %v125_v48 = vld [vmem:[#allocation4 + $0xd8] sm:$0xff]  ;;  %v143_v50 = vld [vmem:[#allocation4 + $0x168] sm:$0xff] }
  0x34   :  { %v129_v49 = vld [vmem:[#allocation4 + $0xf8] sm:$0xff]  ;;  %1951 = vmatprep.subr.bf16.mxu1 %v2964_v44  ;;  %v124_v52 = vld [vmem:[#allocation4 + $0xd0] sm:$0xff]  ;;  %v2976_v54 = vpack.c.bf16 %v134_v43, %v130_v42  ;;  %v2979_v57 = vpack.c.bf16 %v143_v50, %v139_v46  ;;  %v138_v58 = vld [vmem:[#allocation4 + $0x140] sm:$0xff] }
  0x35   :  { %1913 = vmatpush1.bf16.msra.mxu0 %v2949_v25  ;;  %v2973_v51 = vpack.c.bf16 %v129_v49, %v125_v48  ;;  %v128_v53 = vld [vmem:[#allocation4 + $0xf0] sm:$0xff]  ;;  %v133_v55 = vld [vmem:[#allocation4 + $0x118] sm:$0xff]  ;;  %v142_v59 = vld [vmem:[#allocation4 + $0x160] sm:$0xff] }
  0x36   :  { %1915 = vmatprep.subr.bf16.mxu0 %v2953_v29  ;;  %v137_v56 = vld [vmem:[#allocation4 + $0x138] sm:$0xff]  ;;  %v147_v60 = vld [vmem:[#allocation4 + $0x188] sm:$0xff]  ;;  %v2982_v61 = vpack.c.bf16 %v128_v53, %v124_v52  ;;  %v132_v0 = vld [vmem:[#allocation4 + $0x110] sm:$0xff]  ;;  %v2988_v5 = vpack.c.bf16 %v142_v59, %v138_v58 }
  0x37   :  { %1953 = vmatpush1.bf16.msra.mxu1 %v2970_v47  ;;  %v151_v62 = vld [vmem:[#allocation4 + $0x1a8] sm:$0xff]  ;;  %v2985_v63 = vpack.c.bf16 %v137_v56, %v133_v55  ;;  %v136_v1 = vld [vmem:[#allocation4 + $0x130] sm:$0xff]  ;;  %v141_v2 = vld [vmem:[#allocation4 + $0x158] sm:$0xff] }
  0x38   :  { %1955 = vmatprep.subr.bf16.mxu1 %v2973_v51  ;;  %v145_v4 = vld [vmem:[#allocation4 + $0x178] sm:$0xff]  ;;  %v146_v6 = vld [vmem:[#allocation4 + $0x180] sm:$0xff]  ;;  %v2991_v9 = vpack.c.bf16 %v151_v62, %v147_v60  ;;  %v155_v11 = vld [vmem:[#allocation4 + $0x1c8] sm:$0xff]  ;;  %v2994_v14 = vpack.c.bf16 %v136_v1, %v132_v0 }
  0x39   :  { %1917 = vmatpush1.bf16.msra.mxu0 %v2962_v41  ;;  %v150_v10 = vld [vmem:[#allocation4 + $0x1a0] sm:$0xff]  ;;  %v159_v12 = vld [vmem:[#allocation4 + $0x1e8] sm:$0xff]  ;;  %v2997_v15 = vpack.c.bf16 %v145_v4, %v141_v2  ;;  %v140_v17 = vld [vmem:[#allocation4 + $0x150] sm:$0xff] }
  0x3a   :  { %1919 = vmatprep.subr.bf16.mxu0 %v2967_v45  ;;  %v144_v18 = vld [vmem:[#allocation4 + $0x170] sm:$0xff]  ;;  %v59_v19 = vld [vmem:[%s3542_s0] sm:$0xff]  ;;  %v149_v20 = vld [vmem:[#allocation4 + $0x198] sm:$0xff]  ;;  %v3009_v26 = vpack.c.bf16 %v150_v10, %v146_v6  ;;  %v3012_v27 = vpack.c.bf16 %v159_v12, %v155_v11 }
  0x3b   :  { %1957 = vmatpush1.bf16.msra.mxu1 %v2982_v61  ;;  %v153_v22 = vld [vmem:[#allocation4 + $0x1b8] sm:$0xff]  ;;  %68 = vst.msk [vmem:[#allocation2 + $0x8] sm:$0xff] %vm67_vm0, %v59_v19  ;;  %v3006_v23 = vld [vmem:[%s3547_s5] sm:$0xff]  ;;  %v163_v31 = vld [vmem:[#allocation4 + $0x208] sm:$0xff]  ;;  %v3015_v33 = vpack.c.bf16 %v144_v18, %v140_v17 }
  0x3c   :  { %1959 = vmatprep.subr.bf16.mxu1 %v2985_v63  ;;  %v154_v28 = vld [vmem:[#allocation4 + $0x1c0] sm:$0xff]  ;;  %v167_v34 = vld [vmem:[#allocation4 + $0x228] sm:$0xff]  ;;  %v3018_v35 = vpack.c.bf16 %v153_v22, %v149_v20  ;;  %v148_v37 = vld [vmem:[#allocation4 + $0x190] sm:$0xff] }
  0x3d   :  { %1921 = vmatpush1.bf16.msra.mxu0 %v2976_v54  ;;  %v158_v30 = vld [vmem:[#allocation4 + $0x1e0] sm:$0xff]  ;;  %v152_v38 = vld [vmem:[#allocation4 + $0x1b0] sm:$0xff]  ;;  %v157_v39 = vld [vmem:[#allocation4 + $0x1d8] sm:$0xff]  ;;  %v3024_v46 = vpack.c.bf16 %v167_v34, %v163_v31  ;;  %v78_v34 = vlaneseq }
  0x3e   :  { %1923 = vmatprep.subr.bf16.mxu0 %v2979_v57  ;;  %v161_v40 = vld [vmem:[#allocation4 + $0x1f8] sm:$0xff]  ;;  %v3021_v42 = vpack.c.bf16 %v158_v30, %v154_v28  ;;  %v162_v43 = vld [vmem:[#allocation4 + $0x200] sm:$0xff]  ;;  %v171_v49 = vld [vmem:[#allocation4 + $0x248] sm:$0xff]  ;;  %v3027_v52 = vpack.c.bf16 %v152_v38, %v148_v37 }
  0x3f   :  { %1961 = vmatpush1.bf16.msra.mxu1 %v2994_v14  ;;  %v166_v48 = vld [vmem:[#allocation4 + $0x220] sm:$0xff]  ;;  %v175_v50 = vld [vmem:[#allocation4 + $0x268] sm:$0xff]  ;;  %v3030_v55 = vpack.c.bf16 %v161_v40, %v157_v39  ;;  %v156_v56 = vld [vmem:[#allocation4 + $0x1d0] sm:$0xff]  ;;  %v79_v37 = vshrl.u32 %v78_v34, 7 }
  0x40   :  { %1963 = vmatprep.subr.bf16.mxu1 %v2997_v15  ;;  %v160_v58 = vld [vmem:[#allocation4 + $0x1f0] sm:$0xff]  ;;  %v165_v59 = vld [vmem:[#allocation4 + $0x218] sm:$0xff]  ;;  %v3035_v62 = vpack.c.bf16 %v166_v48, %v162_v43  ;;  %v3038_v0 = vpack.c.bf16 %v175_v50, %v171_v49  ;;  %v170_v1 = vld [vmem:[#allocation4 + $0x240] sm:$0xff] }
  0x41   :  { %1925 = vmatpush1.bf16.msra.mxu0 %v2988_v5  ;;  %v169_v60 = vld [vmem:[#allocation4 + $0x238] sm:$0xff]  ;;  %v174_v2 = vld [vmem:[#allocation4 + $0x260] sm:$0xff]  ;;  %v3041_v4 = vpack.c.bf16 %v160_v58, %v156_v56  ;;  %v164_v10 = vld [vmem:[#allocation4 + $0x210] sm:$0xff]  ;;  %v80_v38 = vsub.s32 0, %v79_v37  ;;  %v84_v40 = vsub.s32 1, %v79_v37  ;;  %v92_v49 = vsub.s32 3, %v79_v37 }
  0x42   :  { %1927 = vmatprep.subr.bf16.mxu0 %v2991_v9  ;;  %v185_v53 = vld [vmem:[#allocation2 + $0x8] sm:$0xff]  ;;  %v3044_v6 = vpack.c.bf16 %v169_v60, %v165_v59  ;;  %v168_v11 = vld [vmem:[#allocation4 + $0x230] sm:$0xff]  ;;  %v173_v12 = vld [vmem:[#allocation4 + $0x258] sm:$0xff]  ;;  %v3047_v18 = vpack.c.bf16 %v174_v2, %v170_v1  ;;  %v88_v2 = vsub.s32 2, %v79_v37 }
  0x43   :  { %1965 = vmatpush1.bf16.msra.mxu1 %v3015_v33  ;;  %1793 = vmatprep.mubr.msk.f32.mxu0 %vm67_vm0, %v185_v53  ;;  %v177_v17 = vld [vmem:[#allocation4 + $0x278] sm:$0xff]  ;;  %v3051_v19 = vpack.c.bf16 %v168_v11, %v164_v10  ;;  %v172_v22 = vld [vmem:[#allocation4 + $0x250] sm:$0xff]  ;;  %v76_v39 = vld [vmem:[%s3544_s2] sm:$0xf] }
  0x44   :  { %1967 = vmatprep.subr.bf16.mxu1 %v3018_v35  ;;  %1794 = vmatprep.mubr.msk.f32.mxu1 %vm67_vm0, %v185_v53  ;;  %v3054_v20 = vpack.c.bf16 %v177_v17, %v173_v12  ;;  %v176_v28 = vld [vmem:[#allocation4 + $0x270] sm:$0xff]  ;;  %v3115_v43 = vrot.slane %v76_v39, %v80_v38  ;;  %v3117_v48 = vrot.slane %v76_v39, %v84_v40 }
  0x45   :  { %1929 = vmatpush1.bf16.msra.mxu0 %v3009_v26  ;;  %v3058_v30 = vpack.c.bf16 %v176_v28, %v172_v22  ;;  %v3121_v60 = vrot.slane %v76_v39, %v92_v49  ;;  %v3124_v17 = vrot.slane %v76_v39, %v88_v2  ;;  %v179_v49 = vld [vmem:[%s3548_s6] sm:$0xff] }
  0x46   :  { %1931 = vmatprep.subr.bf16.mxu0 %v3012_v27 }
  0x47   :  { %1969 = vmatpush1.bf16.msra.mxu1 %v3027_v52 }
  0x48   :  { %1971 = vmatprep.subr.bf16.mxu1 %v3030_v55 }
  0x49   :  { %1933 = vmatpush1.bf16.msra.mxu0 %v3021_v42 }
  0x4a   :  { %1935 = vmatprep.subr.bf16.mxu0 %v3024_v46 }
  0x4b   :  { %1973 = vmatpush1.bf16.msra.mxu1 %v3041_v4 }
  0x4c   :  { %1975 = vmatprep.subr.bf16.mxu1 %v3044_v6 }
  0x4d   :  { %1937 = vmatpush1.bf16.msra.mxu0 %v3035_v62 }
  0x4e   :  { %1939 = vmatprep.subr.bf16.mxu0 %v3038_v0 }
  0x4f   :  { %1977 = vmatpush1.bf16.msra.mxu1 %v3051_v19 }
  0x50   :  { %1979 = vmatprep.subr.bf16.mxu1 %v3054_v20 }
  0x51   :  { %1941 = vmatpush1.bf16.msra.mxu0 %v3047_v18 }
  0x52   :  { %1983 = vmatprep.subr.bf16.mxu0 %v2931_v3 }
  0x53   :  { %1981 = vmatpush1.bf16.msra.mxu1 %v3058_v30 }
  0x54   :  { %254 = vmatmul.mubr.f32.vlgmr.msra.gmra.mrb[0].mxu0 %v3006_v23  ;;  %2023 = vmatprep.subr.bf16.mxu1 %v2944_v21 }
  0x55   :  { %1985 = vmatpush1.bf16.msra.mxu0 %v2933_v7 }
  0x56   :  { %1987 = vmatprep.subr.bf16.mxu0 %v2935_v8  ;;  %325 = vmatmul.mubr.f32.vlgmr.msra.gmra.mrb[0].mxu1 %v3006_v23  ;;  %v60_v23 = vld [vmem:[%s3542_s0 + $0x8] sm:$0xff] }
  0x57   :  { %2025 = vmatpush1.bf16.msra.mxu1 %v2946_v24  ;;  %69 = vst.msk [vmem:[#allocation2 + $0x18] sm:$0xff] %vm67_vm0, %v60_v23 }
  0x58   :  { %2027 = vmatprep.subr.bf16.mxu1 %v2956_v32 }
  0x59   :  { %1989 = vmatpush1.bf16.msra.mxu0 %v2939_v13 }
  0x5a   :  { %1991 = vmatprep.subr.bf16.mxu0 %v2942_v16 }
  0x5b   :  { %2029 = vmatpush1.bf16.msra.mxu1 %v2958_v36 }
  0x5c   :  { %2031 = vmatprep.subr.bf16.mxu1 %v2964_v44 }
  0x5d   :  { %1993 = vmatpush1.bf16.msra.mxu0 %v2949_v25 }
  0x5e   :  { %1995 = vmatprep.subr.bf16.mxu0 %v2953_v29  ;;  %v361_v31 = vld [vmem:[#allocation2 + $0x18] sm:$0xff] }
  0x5f   :  { %2033 = vmatpush1.bf16.msra.mxu1 %v2970_v47  ;;  %1798 = vmatprep.mubr.msk.f32.mxu0 %vm67_vm0, %v361_v31 }
  0x60   :  { %2035 = vmatprep.subr.bf16.mxu1 %v2973_v51  ;;  %1799 = vmatprep.mubr.msk.f32.mxu1 %vm67_vm0, %v361_v31 }
  0x61   :  { %1997 = vmatpush1.bf16.msra.mxu0 %v2962_v41 }
  0x62   :  { %1999 = vmatprep.subr.bf16.mxu0 %v2967_v45 }
  0x63   :  { %2037 = vmatpush1.bf16.msra.mxu1 %v2982_v61 }
  0x64   :  { %2039 = vmatprep.subr.bf16.mxu1 %v2985_v63 }
  0x65   :  { %2001 = vmatpush1.bf16.msra.mxu0 %v2976_v54 }
  0x66   :  { %2003 = vmatprep.subr.bf16.mxu0 %v2979_v57 }
  0x67   :  { %2041 = vmatpush1.bf16.msra.mxu1 %v2994_v14 }
  0x68   :  { %2043 = vmatprep.subr.bf16.mxu1 %v2997_v15 }
  0x69   :  { %2005 = vmatpush1.bf16.msra.mxu0 %v2988_v5 }
  0x6a   :  { %2007 = vmatprep.subr.bf16.mxu0 %v2991_v9 }
  0x6b   :  { %2045 = vmatpush1.bf16.msra.mxu1 %v3015_v33 }
  0x6c   :  { %2047 = vmatprep.subr.bf16.mxu1 %v3018_v35 }
  0x6d   :  { %2009 = vmatpush1.bf16.msra.mxu0 %v3009_v26 }
  0x6e   :  { %2011 = vmatprep.subr.bf16.mxu0 %v3012_v27 }
  0x6f   :  { %2049 = vmatpush1.bf16.msra.mxu1 %v3027_v52 }
  0x70   :  { %2051 = vmatprep.subr.bf16.mxu1 %v3030_v55 }
  0x71   :  { %2013 = vmatpush1.bf16.msra.mxu0 %v3021_v42 }
  0x72   :  { %2015 = vmatprep.subr.bf16.mxu0 %v3024_v46 }
  0x73   :  { %2053 = vmatpush1.bf16.msra.mxu1 %v3041_v4 }
  0x74   :  { %2055 = vmatprep.subr.bf16.mxu1 %v3044_v6 }
  0x75   :  { %2017 = vmatpush1.bf16.msra.mxu0 %v3035_v62 }
  0x76   :  { %2019 = vmatprep.subr.bf16.mxu0 %v3038_v0 }
  0x77   :  { %2057 = vmatpush1.bf16.msra.mxu1 %v3051_v19 }
  0x78   :  { %2059 = vmatprep.subr.bf16.mxu1 %v3054_v20 }
  0x79   :  { %2021 = vmatpush1.bf16.msra.mxu0 %v3047_v18 }
  0x7a   :  { %2063 = vmatprep.subr.bf16.mxu0 %v2931_v3 }
  0x7b   :  { %2061 = vmatpush1.bf16.msra.mxu1 %v3058_v30 }
  0x7c   :  { %2103 = vmatprep.subr.bf16.mxu1 %v2944_v21 }
 0x127   :  { %v255_v50 = vpop.f32.mrb[0].mxu0 }
 0x128   :  { %v256_v53 = vadd.f32 %v255_v50, %v3115_v43  ;;  %v257_v56 = vpop.f32.mrb[1].mxu0 }
 0x129   :  { %v258_v58 = vadd.f32 %v257_v56, %v3117_v48  ;;  %v326_v10 = vpop.f32.mrb[0].mxu1 }
 0x12a   :  { %v1795_v59 = vmul.f32 -1.442695, %v256_v53  ;;  %v328_v11 = vpop.f32.mrb[1].mxu1  ;;  %v327_v28 = vadd.f32 %v326_v10, %v3124_v17 }
 0x12b   :  { %v1796_v1 = vmul.f32 -1.442695, %v258_v58  ;;  %v329_v12 = vadd.f32 %v328_v11, %v3121_v60  ;;  %v61_v11 = vld [vmem:[%s3542_s0 + $0x10] sm:$0xff] }
 0x12c   :  { %2599 = vpow2.f32 %v1795_v59  ;;  %70 = vst.msk [vmem:[#allocation2 + $0x28] sm:$0xff] %vm67_vm0, %v61_v11 }
 0x12d   :  { %2601 = vpow2.f32 %v1796_v1  ;;  %v1797_v22 = vmul.f32 -1.442695, %v329_v12 }
 0x12f   :  { %2603 = vpow2.f32 %v1797_v22 }
 0x130   :  { %2605 = vtanh.f32 %v327_v28 }
 0x133   :  { %v538_v12 = vld [vmem:[#allocation2 + $0x28] sm:$0xff] }
 0x136   :  { %v2600_v23 = vpop.eup %2599 }
 0x137   :  { %v2602_v31 = vpop.eup %2601  ;;  %v334_v34 = vadd.f32 1.0, %v2600_v23 }
 0x138   :  { %v340_v38 = vadd.f32 1.0, %v2602_v31 }
 0x139   :  { %2607 = vrcp.f32 %v334_v34  ;;  %v2604_v37 = vpop.eup %2603 }
 0x13a   :  { %2609 = vrcp.f32 %v340_v38  ;;  %v2606_v40 = vpop.eup %2605  ;;  %v347_v39 = vadd.f32 1.0, %v2604_v37 }
 0x13c   :  { %2611 = vrcp.f32 %v347_v39 }
 0x143   :  { %v2608_v50 = vpop.eup %2607 }
 0x144   :  { %v2610_v53 = vpop.eup %2609  ;;  %v351_v56 = vmul.f32 %v2608_v50, %v2606_v40 }
 0x145   :  { %v350_v58 = vmul.f32 %v2610_v53, %v179_v49 }
 0x146   :  { %v2612_v1 = vpop.eup %2611 }
 0x147   :  { %v3130_v59 = vadd.f32 %v351_v56, %v350_v58 }
 0x149   :  { %2613 = vtanh.f32 %v3130_v59 }
 0x153   :  { %v2614_v2 = vpop.eup %2613 }
 0x154   :  { %v3133_v10 = vmul.f32 %v2614_v2, %v2612_v1 }
 0x156   :  { %430 = vmatmul.mubr.f32.vlgmr.msra.gmra.mrb[2].mxu0 %v3133_v10  ;;  %501 = vmatmul.mubr.f32.vlgmr.msra.gmra.mrb[2].mxu1 %v3133_v10 }
 0x157   :  { %2065 = vmatpush1.bf16.msra.mxu0 %v2933_v7  ;;  %2105 = vmatpush1.bf16.msra.mxu1 %v2946_v24 }
 0x158   :  { %2067 = vmatprep.subr.bf16.mxu0 %v2935_v8  ;;  %2107 = vmatprep.subr.bf16.mxu1 %v2956_v32 }
 0x159   :  { %1803 = vmatprep.mubr.msk.f32.mxu0 %vm67_vm0, %v538_v12  ;;  %1804 = vmatprep.mubr.msk.f32.mxu1 %vm67_vm0, %v538_v12 }
 0x15b   :  { %2069 = vmatpush1.bf16.msra.mxu0 %v2939_v13  ;;  %2109 = vmatpush1.bf16.msra.mxu1 %v2958_v36 }
 0x15c   :  { %2071 = vmatprep.subr.bf16.mxu0 %v2942_v16  ;;  %2111 = vmatprep.subr.bf16.mxu1 %v2964_v44 }
 0x15f   :  { %2073 = vmatpush1.bf16.msra.mxu0 %v2949_v25  ;;  %2113 = vmatpush1.bf16.msra.mxu1 %v2970_v47 }
 0x160   :  { %2075 = vmatprep.subr.bf16.mxu0 %v2953_v29  ;;  %2115 = vmatprep.subr.bf16.mxu1 %v2973_v51 }
 0x163   :  { %2077 = vmatpush1.bf16.msra.mxu0 %v2962_v41  ;;  %2117 = vmatpush1.bf16.msra.mxu1 %v2982_v61 }
 0x164   :  { %2079 = vmatprep.subr.bf16.mxu0 %v2967_v45  ;;  %2119 = vmatprep.subr.bf16.mxu1 %v2985_v63 }
 0x167   :  { %2081 = vmatpush1.bf16.msra.mxu0 %v2976_v54  ;;  %2121 = vmatpush1.bf16.msra.mxu1 %v2994_v14 }
 0x168   :  { %2083 = vmatprep.subr.bf16.mxu0 %v2979_v57  ;;  %2123 = vmatprep.subr.bf16.mxu1 %v2997_v15 }
 0x16b   :  { %2085 = vmatpush1.bf16.msra.mxu0 %v2988_v5  ;;  %2125 = vmatpush1.bf16.msra.mxu1 %v3015_v33 }
 0x16c   :  { %2087 = vmatprep.subr.bf16.mxu0 %v2991_v9  ;;  %2127 = vmatprep.subr.bf16.mxu1 %v3018_v35 }
 0x16f   :  { %2089 = vmatpush1.bf16.msra.mxu0 %v3009_v26  ;;  %2129 = vmatpush1.bf16.msra.mxu1 %v3027_v52 }
 0x170   :  { %2091 = vmatprep.subr.bf16.mxu0 %v3012_v27  ;;  %2131 = vmatprep.subr.bf16.mxu1 %v3030_v55 }
 0x173   :  { %2093 = vmatpush1.bf16.msra.mxu0 %v3021_v42  ;;  %2133 = vmatpush1.bf16.msra.mxu1 %v3041_v4 }
 0x174   :  { %2095 = vmatprep.subr.bf16.mxu0 %v3024_v46  ;;  %2135 = vmatprep.subr.bf16.mxu1 %v3044_v6 }
 0x177   :  { %2097 = vmatpush1.bf16.msra.mxu0 %v3035_v62  ;;  %2137 = vmatpush1.bf16.msra.mxu1 %v3051_v19 }
 0x178   :  { %2099 = vmatprep.subr.bf16.mxu0 %v3038_v0  ;;  %2139 = vmatprep.subr.bf16.mxu1 %v3054_v20 }
 0x17b   :  { %2101 = vmatpush1.bf16.msra.mxu0 %v3047_v18  ;;  %2141 = vmatpush1.bf16.msra.mxu1 %v3058_v30 }
 0x17c   :  { %2143 = vmatprep.subr.bf16.mxu0 %v2931_v3  ;;  %2183 = vmatprep.subr.bf16.mxu1 %v2944_v21 }
 0x229   :  { %v431_v22 = vpop.f32.mrb[2].mxu0  ;;  %v502_v28 = vpop.f32.mrb[2].mxu1 }
 0x22a   :  { %v432_v23 = vadd.f32 %v431_v22, %v3115_v43  ;;  %v433_v31 = vpop.f32.mrb[3].mxu0  ;;  %v504_v34 = vpop.f32.mrb[3].mxu1  ;;  %v503_v39 = vadd.f32 %v502_v28, %v3124_v17 }
 0x22b   :  { %v434_v38 = vadd.f32 %v433_v31, %v3117_v48  ;;  %v505_v49 = vadd.f32 %v504_v34, %v3121_v60 }
 0x22c   :  { %v1800_v37 = vmul.f32 -1.442695, %v432_v23 }
 0x22d   :  { %v1801_v40 = vmul.f32 -1.442695, %v434_v38  ;;  %v1802_v50 = vmul.f32 -1.442695, %v505_v49 }
 0x22e   :  { %2615 = vpow2.f32 %v1800_v37 }
 0x22f   :  { %2617 = vpow2.f32 %v1801_v40 }
 0x230   :  { %2619 = vpow2.f32 %v1802_v50 }
 0x231   :  { %2621 = vtanh.f32 %v503_v39 }
 0x238   :  { %v2616_v53 = vpop.eup %2615 }
 0x239   :  { %v2618_v56 = vpop.eup %2617  ;;  %v510_v58 = vadd.f32 1.0, %v2616_v53 }
 0x23a   :  { %v516_v1 = vadd.f32 1.0, %v2618_v56  ;;  %v2620_v2 = vpop.eup %2619 }
 0x23b   :  { %2623 = vrcp.f32 %v510_v58  ;;  %v2622_v11 = vpop.eup %2621  ;;  %v523_v31 = vadd.f32 1.0, %v2620_v2 }
 0x23c   :  { %2625 = vrcp.f32 %v516_v1 }
 0x23d   :  { %2627 = vrcp.f32 %v523_v31 }
 0x245   :  { %v2624_v12 = vpop.eup %2623 }
 0x246   :  { %v2626_v22 = vpop.eup %2625  ;;  %v527_v23 = vmul.f32 %v2624_v12, %v2622_v11 }
 0x247   :  { %v526_v38 = vmul.f32 %v2626_v22, %v3130_v59  ;;  %v2628_v28 = vpop.eup %2627  ;;  %v62_v59 = vld [vmem:[%s3542_s0 + $0x18] sm:$0xff] }
 0x248   :  { %71 = vst.msk [vmem:[#allocation2 + $0x38] sm:$0xff] %vm67_vm0, %v62_v59 }
 0x249   :  { %v3188_v34 = vadd.f32 %v527_v23, %v526_v38 }
 0x24b   :  { %2629 = vtanh.f32 %v3188_v34 }
 0x24f   :  { %v715_v49 = vld [vmem:[#allocation2 + $0x38] sm:$0xff] }
 0x255   :  { %v2630_v37 = vpop.eup %2629 }
 0x256   :  { %v3191_v40 = vmul.f32 %v2630_v37, %v2628_v28 }
 0x258   :  { %607 = vmatmul.mubr.f32.vlgmr.msra.gmra.mrb[4].mxu0 %v3191_v40  ;;  %678 = vmatmul.mubr.f32.vlgmr.msra.gmra.mrb[4].mxu1 %v3191_v40 }
 0x259   :  { %2145 = vmatpush1.bf16.msra.mxu0 %v2933_v7  ;;  %2185 = vmatpush1.bf16.msra.mxu1 %v2946_v24 }
 0x25a   :  { %2147 = vmatprep.subr.bf16.mxu0 %v2935_v8  ;;  %2187 = vmatprep.subr.bf16.mxu1 %v2956_v32 }
 0x25b   :  { %1808 = vmatprep.mubr.msk.f32.mxu0 %vm67_vm0, %v715_v49  ;;  %1809 = vmatprep.mubr.msk.f32.mxu1 %vm67_vm0, %v715_v49 }
 0x25d   :  { %2149 = vmatpush1.bf16.msra.mxu0 %v2939_v13  ;;  %2189 = vmatpush1.bf16.msra.mxu1 %v2958_v36 }
 0x25e   :  { %2151 = vmatprep.subr.bf16.mxu0 %v2942_v16  ;;  %2191 = vmatprep.subr.bf16.mxu1 %v2964_v44 }
 0x261   :  { %2153 = vmatpush1.bf16.msra.mxu0 %v2949_v25  ;;  %2193 = vmatpush1.bf16.msra.mxu1 %v2970_v47 }
 0x262   :  { %2155 = vmatprep.subr.bf16.mxu0 %v2953_v29  ;;  %2195 = vmatprep.subr.bf16.mxu1 %v2973_v51 }
 0x265   :  { %2157 = vmatpush1.bf16.msra.mxu0 %v2962_v41  ;;  %2197 = vmatpush1.bf16.msra.mxu1 %v2982_v61 }
 0x266   :  { %2159 = vmatprep.subr.bf16.mxu0 %v2967_v45  ;;  %2199 = vmatprep.subr.bf16.mxu1 %v2985_v63 }
 0x269   :  { %2161 = vmatpush1.bf16.msra.mxu0 %v2976_v54  ;;  %2201 = vmatpush1.bf16.msra.mxu1 %v2994_v14 }
 0x26a   :  { %2163 = vmatprep.subr.bf16.mxu0 %v2979_v57  ;;  %2203 = vmatprep.subr.bf16.mxu1 %v2997_v15 }
 0x26d   :  { %2165 = vmatpush1.bf16.msra.mxu0 %v2988_v5  ;;  %2205 = vmatpush1.bf16.msra.mxu1 %v3015_v33 }
 0x26e   :  { %2167 = vmatprep.subr.bf16.mxu0 %v2991_v9  ;;  %2207 = vmatprep.subr.bf16.mxu1 %v3018_v35 }
 0x271   :  { %2169 = vmatpush1.bf16.msra.mxu0 %v3009_v26  ;;  %2209 = vmatpush1.bf16.msra.mxu1 %v3027_v52 }
 0x272   :  { %2171 = vmatprep.subr.bf16.mxu0 %v3012_v27  ;;  %2211 = vmatprep.subr.bf16.mxu1 %v3030_v55 }
 0x275   :  { %2173 = vmatpush1.bf16.msra.mxu0 %v3021_v42  ;;  %2213 = vmatpush1.bf16.msra.mxu1 %v3041_v4 }
 0x276   :  { %2175 = vmatprep.subr.bf16.mxu0 %v3024_v46  ;;  %2215 = vmatprep.subr.bf16.mxu1 %v3044_v6 }
 0x279   :  { %2177 = vmatpush1.bf16.msra.mxu0 %v3035_v62  ;;  %2217 = vmatpush1.bf16.msra.mxu1 %v3051_v19 }
 0x27a   :  { %2179 = vmatprep.subr.bf16.mxu0 %v3038_v0  ;;  %2219 = vmatprep.subr.bf16.mxu1 %v3054_v20 }
 0x27d   :  { %2181 = vmatpush1.bf16.msra.mxu0 %v3047_v18  ;;  %2221 = vmatpush1.bf16.msra.mxu1 %v3058_v30 }
 0x27e   :  { %2223 = vmatprep.subr.bf16.mxu0 %v2931_v3  ;;  %2263 = vmatprep.subr.bf16.mxu1 %v2944_v21 }
 0x32b   :  { %v608_v50 = vpop.f32.mrb[4].mxu0  ;;  %v679_v39 = vpop.f32.mrb[4].mxu1 }
 0x32c   :  { %v609_v53 = vadd.f32 %v608_v50, %v3115_v43  ;;  %v610_v56 = vpop.f32.mrb[5].mxu0  ;;  %v681_v58 = vpop.f32.mrb[5].mxu1  ;;  %v680_v23 = vadd.f32 %v679_v39, %v3124_v17 }
 0x32d   :  { %v611_v1 = vadd.f32 %v610_v56, %v3117_v48  ;;  %v682_v12 = vadd.f32 %v681_v58, %v3121_v60 }
 0x32e   :  { %v1805_v2 = vmul.f32 -1.442695, %v609_v53 }
 0x32f   :  { %v1806_v11 = vmul.f32 -1.442695, %v611_v1  ;;  %v1807_v22 = vmul.f32 -1.442695, %v682_v12 }
 0x330   :  { %2631 = vpow2.f32 %v1805_v2 }
 0x331   :  { %2633 = vpow2.f32 %v1806_v11 }
 0x332   :  { %2635 = vpow2.f32 %v1807_v22 }
 0x333   :  { %2637 = vtanh.f32 %v680_v23 }
 0x33a   :  { %v2632_v31 = vpop.eup %2631 }
 0x33b   :  { %v2634_v38 = vpop.eup %2633  ;;  %v687_v28 = vadd.f32 1.0, %v2632_v31 }
 0x33c   :  { %v693_v37 = vadd.f32 1.0, %v2634_v38  ;;  %v2636_v59 = vpop.eup %2635 }
 0x33d   :  { %2639 = vrcp.f32 %v687_v28  ;;  %v2638_v49 = vpop.eup %2637  ;;  %v700_v1 = vadd.f32 1.0, %v2636_v59 }
 0x33e   :  { %2641 = vrcp.f32 %v693_v37 }
 0x33f   :  { %2643 = vrcp.f32 %v700_v1 }
 0x347   :  { %v2640_v50 = vpop.eup %2639 }
 0x348   :  { %v2642_v53 = vpop.eup %2641  ;;  %v704_v56 = vmul.f32 %v2640_v50, %v2638_v49 }
 0x349   :  { %v703_v2 = vmul.f32 %v2642_v53, %v3188_v34  ;;  %v2644_v39 = vpop.eup %2643  ;;  %v63_v34 = vld [vmem:[%s3542_s0 + $0x20] sm:$0xff] }
 0x34a   :  { %72 = vst.msk [vmem:[#allocation2 + $0x48] sm:$0xff] %vm67_vm0, %v63_v34 }
 0x34b   :  { %v3246_v58 = vadd.f32 %v704_v56, %v703_v2 }
 0x34d   :  { %2645 = vtanh.f32 %v3246_v58 }
 0x351   :  { %v892_v22 = vld [vmem:[#allocation2 + $0x48] sm:$0xff] }
 0x357   :  { %v2646_v11 = vpop.eup %2645 }
 0x358   :  { %v3249_v12 = vmul.f32 %v2646_v11, %v2644_v39 }
 0x35a   :  { %784 = vmatmul.mubr.f32.vlgmr.msra.gmra.mrb[6].mxu0 %v3249_v12  ;;  %855 = vmatmul.mubr.f32.vlgmr.msra.gmra.mrb[6].mxu1 %v3249_v12 }
 0x35b   :  { %2225 = vmatpush1.bf16.msra.mxu0 %v2933_v7  ;;  %2265 = vmatpush1.bf16.msra.mxu1 %v2946_v24 }
 0x35c   :  { %2227 = vmatprep.subr.bf16.mxu0 %v2935_v8  ;;  %2267 = vmatprep.subr.bf16.mxu1 %v2956_v32 }
 0x35d   :  { %1813 = vmatprep.mubr.msk.f32.mxu0 %vm67_vm0, %v892_v22  ;;  %1814 = vmatprep.mubr.msk.f32.mxu1 %vm67_vm0, %v892_v22 }
 0x35f   :  { %2229 = vmatpush1.bf16.msra.mxu0 %v2939_v13  ;;  %2269 = vmatpush1.bf16.msra.mxu1 %v2958_v36 }
 0x360   :  { %2231 = vmatprep.subr.bf16.mxu0 %v2942_v16  ;;  %2271 = vmatprep.subr.bf16.mxu1 %v2964_v44 }
 0x363   :  { %2233 = vmatpush1.bf16.msra.mxu0 %v2949_v25  ;;  %2273 = vmatpush1.bf16.msra.mxu1 %v2970_v47 }
 0x364   :  { %2235 = vmatprep.subr.bf16.mxu0 %v2953_v29  ;;  %2275 = vmatprep.subr.bf16.mxu1 %v2973_v51 }
 0x367   :  { %2237 = vmatpush1.bf16.msra.mxu0 %v2962_v41  ;;  %2277 = vmatpush1.bf16.msra.mxu1 %v2982_v61 }
 0x368   :  { %2239 = vmatprep.subr.bf16.mxu0 %v2967_v45  ;;  %2279 = vmatprep.subr.bf16.mxu1 %v2985_v63 }
 0x36b   :  { %2241 = vmatpush1.bf16.msra.mxu0 %v2976_v54  ;;  %2281 = vmatpush1.bf16.msra.mxu1 %v2994_v14 }
 0x36c   :  { %2243 = vmatprep.subr.bf16.mxu0 %v2979_v57  ;;  %2283 = vmatprep.subr.bf16.mxu1 %v2997_v15 }
 0x36f   :  { %2245 = vmatpush1.bf16.msra.mxu0 %v2988_v5  ;;  %2285 = vmatpush1.bf16.msra.mxu1 %v3015_v33 }
 0x370   :  { %2247 = vmatprep.subr.bf16.mxu0 %v2991_v9  ;;  %2287 = vmatprep.subr.bf16.mxu1 %v3018_v35 }
 0x373   :  { %2249 = vmatpush1.bf16.msra.mxu0 %v3009_v26  ;;  %2289 = vmatpush1.bf16.msra.mxu1 %v3027_v52 }
 0x374   :  { %2251 = vmatprep.subr.bf16.mxu0 %v3012_v27  ;;  %2291 = vmatprep.subr.bf16.mxu1 %v3030_v55 }
 0x377   :  { %2253 = vmatpush1.bf16.msra.mxu0 %v3021_v42  ;;  %2293 = vmatpush1.bf16.msra.mxu1 %v3041_v4 }
 0x378   :  { %2255 = vmatprep.subr.bf16.mxu0 %v3024_v46  ;;  %2295 = vmatprep.subr.bf16.mxu1 %v3044_v6 }
 0x37b   :  { %2257 = vmatpush1.bf16.msra.mxu0 %v3035_v62  ;;  %2297 = vmatpush1.bf16.msra.mxu1 %v3051_v19 }
 0x37c   :  { %2259 = vmatprep.subr.bf16.mxu0 %v3038_v0  ;;  %2299 = vmatprep.subr.bf16.mxu1 %v3054_v20 }
 0x37f   :  { %2261 = vmatpush1.bf16.msra.mxu0 %v3047_v18  ;;  %2301 = vmatpush1.bf16.msra.mxu1 %v3058_v30 }
 0x380   :  { %2303 = vmatprep.subr.bf16.mxu0 %v2931_v3  ;;  %2343 = vmatprep.subr.bf16.mxu1 %v2944_v21 }
 0x42d   :  { %v785_v23 = vpop.f32.mrb[6].mxu0  ;;  %v856_v31 = vpop.f32.mrb[6].mxu1 }
 0x42e   :  { %v786_v38 = vadd.f32 %v785_v23, %v3115_v43  ;;  %v787_v28 = vpop.f32.mrb[7].mxu0  ;;  %v858_v37 = vpop.f32.mrb[7].mxu1  ;;  %v857_v1 = vadd.f32 %v856_v31, %v3124_v17 }
 0x42f   :  { %v788_v59 = vadd.f32 %v787_v28, %v3117_v48  ;;  %v859_v53 = vadd.f32 %v858_v37, %v3121_v60 }
 0x430   :  { %v1810_v49 = vmul.f32 -1.442695, %v786_v38 }
 0x431   :  { %v1811_v50 = vmul.f32 -1.442695, %v788_v59  ;;  %v1812_v56 = vmul.f32 -1.442695, %v859_v53 }
 0x432   :  { %2647 = vpow2.f32 %v1810_v49 }
 0x433   :  { %2649 = vpow2.f32 %v1811_v50 }
 0x434   :  { %2651 = vpow2.f32 %v1812_v56 }
 0x435   :  { %2653 = vtanh.f32 %v857_v1 }
 0x43c   :  { %v2648_v2 = vpop.eup %2647 }
 0x43d   :  { %v2650_v39 = vpop.eup %2649  ;;  %v864_v11 = vadd.f32 1.0, %v2648_v2 }
 0x43e   :  { %v870_v34 = vadd.f32 1.0, %v2650_v39  ;;  %v2652_v22 = vpop.eup %2651 }
 0x43f   :  { %2655 = vrcp.f32 %v864_v11  ;;  %v2654_v23 = vpop.eup %2653  ;;  %v877_v49 = vadd.f32 1.0, %v2652_v22 }
 0x440   :  { %2657 = vrcp.f32 %v870_v34 }
 0x441   :  { %2659 = vrcp.f32 %v877_v49 }
 0x449   :  { %v2656_v28 = vpop.eup %2655 }
 0x44a   :  { %v2658_v38 = vpop.eup %2657  ;;  %v881_v59 = vmul.f32 %v2656_v28, %v2654_v23 }
 0x44b   :  { %v880_v50 = vmul.f32 %v2658_v38, %v3246_v58  ;;  %v2660_v31 = vpop.eup %2659  ;;  %v64_v58 = vld [vmem:[%s3542_s0 + $0x28] sm:$0xff] }
 0x44c   :  { %73 = vst.msk [vmem:[#allocation2 + $0x58] sm:$0xff] %vm67_vm0, %v64_v58 }
 0x44d   :  { %v3304_v37 = vadd.f32 %v881_v59, %v880_v50 }
 0x44f   :  { %2661 = vtanh.f32 %v3304_v37 }
 0x453   :  { %v1069_v1 = vld [vmem:[#allocation2 + $0x58] sm:$0xff] }
 0x459   :  { %v2662_v53 = vpop.eup %2661 }
 0x45a   :  { %v3307_v56 = vmul.f32 %v2662_v53, %v2660_v31 }
 0x45c   :  { %3553 = vst [vmem:[#allocation17_spill] sm:$0xff] %v3307_v56  ;;  %961 = vmatmul.mubr.f32.vlgmr.msra.gmra.mrb[8].mxu0 %v3307_v56  ;;  %1032 = vmatmul.mubr.f32.vlgmr.msra.gmra.mrb[8].mxu1 %v3307_v56 }
 0x45d   :  { %2305 = vmatpush1.bf16.msra.mxu0 %v2933_v7  ;;  %2345 = vmatpush1.bf16.msra.mxu1 %v2946_v24 }
 0x45e   :  { %2307 = vmatprep.subr.bf16.mxu0 %v2935_v8  ;;  %2347 = vmatprep.subr.bf16.mxu1 %v2956_v32 }
 0x45f   :  { %1818 = vmatprep.mubr.msk.f32.mxu0 %vm67_vm0, %v1069_v1  ;;  %1819 = vmatprep.mubr.msk.f32.mxu1 %vm67_vm0, %v1069_v1 }
 0x461   :  { %2309 = vmatpush1.bf16.msra.mxu0 %v2939_v13  ;;  %2349 = vmatpush1.bf16.msra.mxu1 %v2958_v36 }
 0x462   :  { %2311 = vmatprep.subr.bf16.mxu0 %v2942_v16  ;;  %2351 = vmatprep.subr.bf16.mxu1 %v2964_v44 }
 0x465   :  { %2313 = vmatpush1.bf16.msra.mxu0 %v2949_v25  ;;  %2353 = vmatpush1.bf16.msra.mxu1 %v2970_v47 }
 0x466   :  { %2315 = vmatprep.subr.bf16.mxu0 %v2953_v29  ;;  %2355 = vmatprep.subr.bf16.mxu1 %v2973_v51 }
 0x469   :  { %2317 = vmatpush1.bf16.msra.mxu0 %v2962_v41  ;;  %2357 = vmatpush1.bf16.msra.mxu1 %v2982_v61 }
 0x46a   :  { %2319 = vmatprep.subr.bf16.mxu0 %v2967_v45  ;;  %2359 = vmatprep.subr.bf16.mxu1 %v2985_v63 }
 0x46d   :  { %2321 = vmatpush1.bf16.msra.mxu0 %v2976_v54  ;;  %2361 = vmatpush1.bf16.msra.mxu1 %v2994_v14 }
 0x46e   :  { %2323 = vmatprep.subr.bf16.mxu0 %v2979_v57  ;;  %2363 = vmatprep.subr.bf16.mxu1 %v2997_v15 }
 0x471   :  { %2325 = vmatpush1.bf16.msra.mxu0 %v2988_v5  ;;  %2365 = vmatpush1.bf16.msra.mxu1 %v3015_v33 }
 0x472   :  { %2327 = vmatprep.subr.bf16.mxu0 %v2991_v9  ;;  %2367 = vmatprep.subr.bf16.mxu1 %v3018_v35 }
 0x475   :  { %2329 = vmatpush1.bf16.msra.mxu0 %v3009_v26  ;;  %2369 = vmatpush1.bf16.msra.mxu1 %v3027_v52 }
 0x476   :  { %2331 = vmatprep.subr.bf16.mxu0 %v3012_v27  ;;  %2371 = vmatprep.subr.bf16.mxu1 %v3030_v55 }
 0x479   :  { %2333 = vmatpush1.bf16.msra.mxu0 %v3021_v42  ;;  %2373 = vmatpush1.bf16.msra.mxu1 %v3041_v4 }
 0x47a   :  { %2335 = vmatprep.subr.bf16.mxu0 %v3024_v46  ;;  %2375 = vmatprep.subr.bf16.mxu1 %v3044_v6 }
 0x47d   :  { %2337 = vmatpush1.bf16.msra.mxu0 %v3035_v62  ;;  %2377 = vmatpush1.bf16.msra.mxu1 %v3051_v19 }
 0x47e   :  { %2339 = vmatprep.subr.bf16.mxu0 %v3038_v0  ;;  %2379 = vmatprep.subr.bf16.mxu1 %v3054_v20 }
 0x481   :  { %2341 = vmatpush1.bf16.msra.mxu0 %v3047_v18  ;;  %2381 = vmatpush1.bf16.msra.mxu1 %v3058_v30 }
 0x482   :  { %2383 = vmatprep.subr.bf16.mxu0 %v2931_v3  ;;  %2423 = vmatprep.subr.bf16.mxu1 %v2944_v21 }
 0x52f   :  { %v962_v2 = vpop.f32.mrb[8].mxu0  ;;  %v1033_v39 = vpop.f32.mrb[8].mxu1 }
 0x530   :  { %v963_v11 = vadd.f32 %v962_v2, %v3115_v43  ;;  %v964_v34 = vpop.f32.mrb[9].mxu0  ;;  %v1035_v22 = vpop.f32.mrb[9].mxu1  ;;  %v1034_v50 = vadd.f32 %v1033_v39, %v3124_v17 }
 0x531   :  { %v965_v23 = vadd.f32 %v964_v34, %v3117_v48  ;;  %v1036_v59 = vadd.f32 %v1035_v22, %v3121_v60 }
 0x532   :  { %v1815_v28 = vmul.f32 -1.442695, %v963_v11 }
 0x533   :  { %v1816_v38 = vmul.f32 -1.442695, %v965_v23  ;;  %v1817_v49 = vmul.f32 -1.442695, %v1036_v59 }
 0x534   :  { %2663 = vpow2.f32 %v1815_v28 }
 0x535   :  { %2665 = vpow2.f32 %v1816_v38 }
 0x536   :  { %2667 = vpow2.f32 %v1817_v49 }
 0x537   :  { %2669 = vtanh.f32 %v1034_v50 }
 0x53e   :  { %v2664_v31 = vpop.eup %2663 }
 0x53f   :  { %v2666_v53 = vpop.eup %2665  ;;  %v1041_v58 = vadd.f32 1.0, %v2664_v31 }
 0x540   :  { %v1047_v1 = vadd.f32 1.0, %v2666_v53  ;;  %v2668_v2 = vpop.eup %2667 }
 0x541   :  { %2671 = vrcp.f32 %v1041_v58  ;;  %v2670_v56 = vpop.eup %2669  ;;  %v1054_v28 = vadd.f32 1.0, %v2668_v2 }
 0x542   :  { %2673 = vrcp.f32 %v1047_v1 }
 0x543   :  { %2675 = vrcp.f32 %v1054_v28 }
 0x54b   :  { %v2672_v34 = vpop.eup %2671 }
 0x54c   :  { %v2674_v11 = vpop.eup %2673  ;;  %v1058_v23 = vmul.f32 %v2672_v34, %v2670_v56 }
 0x54d   :  { %v1057_v38 = vmul.f32 %v2674_v11, %v3304_v37  ;;  %v2676_v39 = vpop.eup %2675  ;;  %v65_v37 = vld [vmem:[%s3542_s0 + $0x30] sm:$0xff] }
 0x54e   :  { %74 = vst.msk [vmem:[#allocation2 + $0x68] sm:$0xff] %vm67_vm0, %v65_v37 }
 0x54f   :  { %v3362_v22 = vadd.f32 %v1058_v23, %v1057_v38 }
 0x551   :  { %2677 = vtanh.f32 %v3362_v22 }
 0x555   :  { %v1246_v56 = vld [vmem:[#allocation2 + $0x68] sm:$0xff] }
 0x55b   :  { %v2678_v59 = vpop.eup %2677 }
 0x55c   :  { %v3365_v49 = vmul.f32 %v2678_v59, %v2676_v39 }
 0x55e   :  { %1138 = vmatmul.mubr.f32.vlgmr.msra.gmra.mrb[10].mxu0 %v3365_v49  ;;  %1209 = vmatmul.mubr.f32.vlgmr.msra.gmra.mrb[10].mxu1 %v3365_v49 }
 0x55f   :  { %2385 = vmatpush1.bf16.msra.mxu0 %v2933_v7  ;;  %2425 = vmatpush1.bf16.msra.mxu1 %v2946_v24 }
 0x560   :  { %2387 = vmatprep.subr.bf16.mxu0 %v2935_v8  ;;  %2427 = vmatprep.subr.bf16.mxu1 %v2956_v32 }
 0x561   :  { %1823 = vmatprep.mubr.msk.f32.mxu0 %vm67_vm0, %v1246_v56  ;;  %1824 = vmatprep.mubr.msk.f32.mxu1 %vm67_vm0, %v1246_v56 }
 0x563   :  { %2389 = vmatpush1.bf16.msra.mxu0 %v2939_v13  ;;  %2429 = vmatpush1.bf16.msra.mxu1 %v2958_v36 }
 0x564   :  { %2391 = vmatprep.subr.bf16.mxu0 %v2942_v16  ;;  %2431 = vmatprep.subr.bf16.mxu1 %v2964_v44 }
 0x567   :  { %2393 = vmatpush1.bf16.msra.mxu0 %v2949_v25  ;;  %2433 = vmatpush1.bf16.msra.mxu1 %v2970_v47 }
 0x568   :  { %2395 = vmatprep.subr.bf16.mxu0 %v2953_v29  ;;  %2435 = vmatprep.subr.bf16.mxu1 %v2973_v51 }
 0x56b   :  { %2397 = vmatpush1.bf16.msra.mxu0 %v2962_v41  ;;  %2437 = vmatpush1.bf16.msra.mxu1 %v2982_v61 }
 0x56c   :  { %2399 = vmatprep.subr.bf16.mxu0 %v2967_v45  ;;  %2439 = vmatprep.subr.bf16.mxu1 %v2985_v63 }
 0x56f   :  { %2401 = vmatpush1.bf16.msra.mxu0 %v2976_v54  ;;  %2441 = vmatpush1.bf16.msra.mxu1 %v2994_v14 }
 0x570   :  { %2403 = vmatprep.subr.bf16.mxu0 %v2979_v57  ;;  %2443 = vmatprep.subr.bf16.mxu1 %v2997_v15 }
 0x573   :  { %2405 = vmatpush1.bf16.msra.mxu0 %v2988_v5  ;;  %2445 = vmatpush1.bf16.msra.mxu1 %v3015_v33 }
 0x574   :  { %2407 = vmatprep.subr.bf16.mxu0 %v2991_v9  ;;  %2447 = vmatprep.subr.bf16.mxu1 %v3018_v35 }
 0x577   :  { %2409 = vmatpush1.bf16.msra.mxu0 %v3009_v26  ;;  %2449 = vmatpush1.bf16.msra.mxu1 %v3027_v52 }
 0x578   :  { %2411 = vmatprep.subr.bf16.mxu0 %v3012_v27  ;;  %2451 = vmatprep.subr.bf16.mxu1 %v3030_v55 }
 0x57b   :  { %2413 = vmatpush1.bf16.msra.mxu0 %v3021_v42  ;;  %2453 = vmatpush1.bf16.msra.mxu1 %v3041_v4 }
 0x57c   :  { %2415 = vmatprep.subr.bf16.mxu0 %v3024_v46  ;;  %2455 = vmatprep.subr.bf16.mxu1 %v3044_v6 }
 0x57f   :  { %2417 = vmatpush1.bf16.msra.mxu0 %v3035_v62  ;;  %2457 = vmatpush1.bf16.msra.mxu1 %v3051_v19 }
 0x580   :  { %2419 = vmatprep.subr.bf16.mxu0 %v3038_v0  ;;  %2459 = vmatprep.subr.bf16.mxu1 %v3054_v20 }
 0x583   :  { %2421 = vmatpush1.bf16.msra.mxu0 %v3047_v18  ;;  %2461 = vmatpush1.bf16.msra.mxu1 %v3058_v30 }
 0x584   :  { %2463 = vmatprep.subr.bf16.mxu0 %v2931_v3  ;;  %2503 = vmatprep.subr.bf16.mxu1 %v2944_v21 }
 0x631   :  { %v1139_v50 = vpop.f32.mrb[10].mxu0  ;;  %v1210_v31 = vpop.f32.mrb[10].mxu1 }
 0x632   :  { %v1140_v53 = vadd.f32 %v1139_v50, %v3115_v43  ;;  %v1141_v58 = vpop.f32.mrb[11].mxu0  ;;  %v1212_v1 = vpop.f32.mrb[11].mxu1  ;;  %v1211_v23 = vadd.f32 %v1210_v31, %v3124_v17 }
 0x633   :  { %v1142_v3 = vadd.f32 %v1141_v58, %v3117_v48  ;;  %v1213_v34 = vadd.f32 %v1212_v1, %v3121_v60 }
 0x634   :  { %v1820_v21 = vmul.f32 -1.442695, %v1140_v53 }
 0x635   :  { %v1821_v2 = vmul.f32 -1.442695, %v1142_v3  ;;  %v1822_v11 = vmul.f32 -1.442695, %v1213_v34 }
 0x636   :  { %2679 = vpow2.f32 %v1820_v21 }
 0x637   :  { %2681 = vpow2.f32 %v1821_v2 }
 0x638   :  { %2683 = vpow2.f32 %v1822_v11 }
 0x639   :  { %2685 = vtanh.f32 %v1211_v23  ;;  %v1611_v23 = vld [vmem:[#allocation7 + $0x40] sm:$0xff] }
 0x640   :  { %v2680_v28 = vpop.eup %2679 }
 0x641   :  { %v2682_v38 = vpop.eup %2681  ;;  %v1218_v39 = vadd.f32 1.0, %v2680_v28  ;;  %v1612_v28 = vld [vmem:[#allocation7 + $0x48] sm:$0xff] }
 0x642   :  { %v1224_v59 = vadd.f32 1.0, %v2682_v38  ;;  %v2684_v37 = vpop.eup %2683  ;;  %v2558_v38 = vpack.c.bf16 %v1612_v28, %v1611_v23 }
 0x643   :  { %2687 = vrcp.f32 %v1218_v39  ;;  %v2686_v56 = vpop.eup %2685  ;;  %v1231_v3 = vadd.f32 1.0, %v2684_v37  ;;  %v1614_v39 = vld [vmem:[#allocation7 + $0x58] sm:$0xff]  ;;  %v1616_v37 = vld [vmem:[#allocation7 + $0x68] sm:$0xff] }
 0x644   :  { %2689 = vrcp.f32 %v1224_v59  ;;  %v1615_v59 = vld [vmem:[#allocation7 + $0x60] sm:$0xff] }
 0x645   :  { %2691 = vrcp.f32 %v1231_v3  ;;  %v3554_v3 = vld [vmem:[#allocation17_spill] sm:$0xff] }
 0x64d   :  { %v2688_v50 = vpop.eup %2687 }
 0x64e   :  { %v2690_v53 = vpop.eup %2689  ;;  %v1235_v58 = vmul.f32 %v2688_v50, %v2686_v56  ;;  %v2566_v56 = vpack.c.bf16 %v1616_v37, %v1615_v59  ;;  %v1617_v50 = vld [vmem:[#allocation7 + $0x70] sm:$0xff] }
 0x64f   :  { %v1234_v21 = vmul.f32 %v2690_v53, %v3362_v22  ;;  %v2692_v31 = vpop.eup %2691  ;;  %v1610_v22 = vld [vmem:[#allocation7 + $0x38] sm:$0xff] }
 0x650   :  { %v1618_v53 = vld [vmem:[#allocation7 + $0x78] sm:$0xff] }
 0x651   :  { %v3420_v1 = vadd.f32 %v1235_v58, %v1234_v21  ;;  %v2570_v58 = vpack.c.bf16 %v1618_v53, %v1617_v50 }
 0x653   :  { %2693 = vtanh.f32 %v3420_v1 }
 0x65d   :  { %v2694_v2 = vpop.eup %2693 }
 0x65e   :  { %v3423_v34 = vmul.f32 %v2694_v2, %v2692_v31 }
 0x660   :  { %1315 = vmatmul.mubr.f32.vlgmr.msra.gmra.mrb[12].mxu0 %v3423_v34  ;;  %1386 = vmatmul.mubr.f32.vlgmr.msra.gmra.mrb[12].mxu1 %v3423_v34 }
 0x661   :  { %2465 = vmatpush1.bf16.msra.mxu0 %v2933_v7  ;;  %2505 = vmatpush1.bf16.msra.mxu1 %v2946_v24  ;;  %v66_v7 = vld [vmem:[%s3542_s0 + $0x38] sm:$0xff] }
 0x662   :  { %2467 = vmatprep.subr.bf16.mxu0 %v2935_v8  ;;  %2507 = vmatprep.subr.bf16.mxu1 %v2956_v32  ;;  %75 = vst.msk [vmem:[#allocation2 + $0x78] sm:$0xff] %vm67_vm0, %v66_v7  ;;  %v1603_v8 = vld [vmem:[#allocation7] sm:$0xff] }
 0x665   :  { %2469 = vmatpush1.bf16.msra.mxu0 %v2939_v13  ;;  %2509 = vmatpush1.bf16.msra.mxu1 %v2958_v36  ;;  %v1604_v13 = vld [vmem:[#allocation7 + $0x8] sm:$0xff] }
 0x666   :  { %2471 = vmatprep.subr.bf16.mxu0 %v2942_v16  ;;  %2511 = vmatprep.subr.bf16.mxu1 %v2964_v44  ;;  %v2542_v16 = vpack.c.bf16 %v1604_v13, %v1603_v8 }
 0x669   :  { %2473 = vmatpush1.bf16.msra.mxu0 %v2949_v25  ;;  %2513 = vmatpush1.bf16.msra.mxu1 %v2970_v47  ;;  %v1423_v24 = vld [vmem:[#allocation2 + $0x78] sm:$0xff] }
 0x66a   :  { %2475 = vmatprep.subr.bf16.mxu0 %v2953_v29  ;;  %2515 = vmatprep.subr.bf16.mxu1 %v2973_v51 }
 0x66b   :  { %1828 = vmatprep.mubr.msk.f32.mxu0 %vm67_vm0, %v1423_v24  ;;  %1829 = vmatprep.mubr.msk.f32.mxu1 %vm67_vm0, %v1423_v24 }
 0x66d   :  { %2477 = vmatpush1.bf16.msra.mxu0 %v2962_v41  ;;  %2517 = vmatpush1.bf16.msra.mxu1 %v2982_v61 }
 0x66e   :  { %2479 = vmatprep.subr.bf16.mxu0 %v2967_v45  ;;  %2519 = vmatprep.subr.bf16.mxu1 %v2985_v63 }
 0x671   :  { %2481 = vmatpush1.bf16.msra.mxu0 %v2976_v54  ;;  %2521 = vmatpush1.bf16.msra.mxu1 %v2994_v14 }
 0x672   :  { %2483 = vmatprep.subr.bf16.mxu0 %v2979_v57  ;;  %2523 = vmatprep.subr.bf16.mxu1 %v2997_v15 }
 0x675   :  { %2485 = vmatpush1.bf16.msra.mxu0 %v2988_v5  ;;  %2525 = vmatpush1.bf16.msra.mxu1 %v3015_v33 }
 0x676   :  { %2487 = vmatprep.subr.bf16.mxu0 %v2991_v9  ;;  %2527 = vmatprep.subr.bf16.mxu1 %v3018_v35 }
 0x679   :  { %2489 = vmatpush1.bf16.msra.mxu0 %v3009_v26  ;;  %2529 = vmatpush1.bf16.msra.mxu1 %v3027_v52 }
 0x67a   :  { %2491 = vmatprep.subr.bf16.mxu0 %v3012_v27  ;;  %2531 = vmatprep.subr.bf16.mxu1 %v3030_v55  ;;  %v1605_v55 = vld [vmem:[#allocation7 + $0x10] sm:$0xff] }
 0x67d   :  { %2493 = vmatpush1.bf16.msra.mxu0 %v3021_v42  ;;  %2533 = vmatpush1.bf16.msra.mxu1 %v3041_v4 }
 0x67e   :  { %2495 = vmatprep.subr.bf16.mxu0 %v3024_v46  ;;  %2535 = vmatprep.subr.bf16.mxu1 %v3044_v6 }
 0x681   :  { %2497 = vmatpush1.bf16.msra.mxu0 %v3035_v62  ;;  %2537 = vmatpush1.bf16.msra.mxu1 %v3051_v19  ;;  %v1606_v62 = vld [vmem:[#allocation7 + $0x18] sm:$0xff]  ;;  %v1608_v19 = vld [vmem:[#allocation7 + $0x28] sm:$0xff] }
 0x682   :  { %2499 = vmatprep.subr.bf16.mxu0 %v3038_v0  ;;  %2539 = vmatprep.subr.bf16.mxu1 %v3054_v20  ;;  %v2546_v6 = vpack.c.bf16 %v1606_v62, %v1605_v55 }
 0x685   :  { %2501 = vmatpush1.bf16.msra.mxu0 %v3047_v18  ;;  %2541 = vmatpush1.bf16.msra.mxu1 %v3058_v30  ;;  %v1607_v18 = vld [vmem:[#allocation7 + $0x20] sm:$0xff]  ;;  %v1609_v30 = vld [vmem:[#allocation7 + $0x30] sm:$0xff] }
 0x686   :  { %2543 = vmatprep.subr.bf16.mxu0 %v2542_v16  ;;  %2574 = vmatprep.subr.bf16.mxu1 %v2542_v16  ;;  %v2550_v20 = vpack.c.bf16 %v1608_v19, %v1607_v18  ;;  %v2554_v11 = vpack.c.bf16 %v1610_v22, %v1609_v30 }
 0x733   :  { %v1316_v25 = vpop.f32.mrb[12].mxu0  ;;  %v1387_v29 = vpop.f32.mrb[12].mxu1 }
 0x734   :  { %v1317_v32 = vadd.f32 %v1316_v25, %v3115_v43  ;;  %v1318_v36 = vpop.f32.mrb[13].mxu0  ;;  %v1389_v41 = vpop.f32.mrb[13].mxu1  ;;  %v1388_v57 = vadd.f32 %v1387_v29, %v3124_v17 }
 0x735   :  { %v1319_v44 = vadd.f32 %v1318_v36, %v3117_v48  ;;  %v1390_v51 = vadd.f32 %v1389_v41, %v3121_v60 }
 0x736   :  { %v1825_v45 = vmul.f32 -1.442695, %v1317_v32 }
 0x737   :  { %v1826_v47 = vmul.f32 -1.442695, %v1319_v44  ;;  %v1827_v54 = vmul.f32 -1.442695, %v1390_v51 }
 0x738   :  { %2695 = vpow2.f32 %v1825_v45 }
 0x739   :  { %2697 = vpow2.f32 %v1826_v47 }
 0x73a   :  { %2699 = vpow2.f32 %v1827_v54 }
 0x73b   :  { %2701 = vtanh.f32 %v1388_v57 }
 0x742   :  { %v2696_v61 = vpop.eup %2695 }
 0x743   :  { %v2698_v63 = vpop.eup %2697  ;;  %v1395_v5 = vadd.f32 1.0, %v2696_v61 }
 0x744   :  { %v1401_v9 = vadd.f32 1.0, %v2698_v63  ;;  %v2700_v14 = vpop.eup %2699 }
 0x745   :  { %2703 = vrcp.f32 %v1395_v5  ;;  %v2702_v15 = vpop.eup %2701  ;;  %v1408_v35 = vadd.f32 1.0, %v2700_v14 }
 0x746   :  { %2705 = vrcp.f32 %v1401_v9 }
 0x747   :  { %2707 = vrcp.f32 %v1408_v35 }
 0x74f   :  { %v2704_v26 = vpop.eup %2703 }
 0x750   :  { %v2706_v27 = vpop.eup %2705  ;;  %v1412_v33 = vmul.f32 %v2704_v26, %v2702_v15 }
 0x751   :  { %v1411_v42 = vmul.f32 %v2706_v27, %v3420_v1  ;;  %v2708_v52 = vpop.eup %2707 }
 0x753   :  { %v3476_v46 = vadd.f32 %v1412_v33, %v1411_v42 }
 0x755   :  { %2709 = vtanh.f32 %v3476_v46 }
 0x75f   :  { %v2710_v0 = vpop.eup %2709 }
 0x760   :  { %v1415_v4 = vmul.f32 %v2710_v0, %v2708_v52 }
 0x762   :  { %1492 = vmatmul.mubr.f32.vlgmr.msra.gmra.mrb[14].mxu0 %v1415_v4  ;;  %1563 = vmatmul.mubr.f32.vlgmr.msra.gmra.mrb[14].mxu1 %v1415_v4 }
 0x763   :  { %2545 = vmatpush3.bf16.msra.mxu0 %v2542_v16  ;;  %2582 = vmatpush3.bf16.msra.mxu1 %v2542_v16 }
 0x764   :  { %1890 = vmatprep.mubr.f32.mxu0 %v3133_v10  ;;  %1896 = vmatprep.mubr.f32.mxu1 %v3365_v49  ;;  %v1613_v10 = vld [vmem:[#allocation7 + $0x50] sm:$0xff] }
 0x765   :  { %2547 = vmatprep.subr.bf16.mxu0 %v2546_v6  ;;  %2575 = vmatprep.subr.bf16.mxu1 %v2546_v6  ;;  %v2562_v49 = vpack.c.bf16 %v1614_v39, %v1613_v10 }
 0x767   :  { %2549 = vmatpush3.bf16.msra.mxu0 %v2546_v6  ;;  %2583 = vmatpush3.bf16.msra.mxu1 %v2546_v6 }
 0x768   :  { %2551 = vmatprep.subr.bf16.mxu0 %v2550_v20  ;;  %2576 = vmatprep.subr.bf16.mxu1 %v2550_v20 }
 0x76b   :  { %2553 = vmatpush3.bf16.msra.mxu0 %v2550_v20  ;;  %2584 = vmatpush3.bf16.msra.mxu1 %v2550_v20 }
 0x76c   :  { %2555 = vmatprep.subr.bf16.mxu0 %v2554_v11  ;;  %2577 = vmatprep.subr.bf16.mxu1 %v2554_v11 }
 0x76f   :  { %2557 = vmatpush3.bf16.msra.mxu0 %v2554_v11  ;;  %2585 = vmatpush3.bf16.msra.mxu1 %v2554_v11 }
 0x770   :  { %2559 = vmatprep.subr.bf16.mxu0 %v2558_v38  ;;  %2578 = vmatprep.subr.bf16.mxu1 %v2558_v38 }
 0x773   :  { %2561 = vmatpush3.bf16.msra.mxu0 %v2558_v38  ;;  %2586 = vmatpush3.bf16.msra.mxu1 %v2558_v38 }
 0x774   :  { %2563 = vmatprep.subr.bf16.mxu0 %v2562_v49  ;;  %2579 = vmatprep.subr.bf16.mxu1 %v2562_v49 }
 0x777   :  { %2565 = vmatpush3.bf16.msra.mxu0 %v2562_v49  ;;  %2587 = vmatpush3.bf16.msra.mxu1 %v2562_v49 }
 0x778   :  { %2567 = vmatprep.subr.bf16.mxu0 %v2566_v56  ;;  %2580 = vmatprep.subr.bf16.mxu1 %v2566_v56 }
 0x77b   :  { %2569 = vmatpush3.bf16.msra.mxu0 %v2566_v56  ;;  %2588 = vmatpush3.bf16.msra.mxu1 %v2566_v56 }
 0x77c   :  { %2571 = vmatprep.subr.bf16.mxu0 %v2570_v58  ;;  %2581 = vmatprep.subr.bf16.mxu1 %v2570_v58 }
 0x77f   :  { %2573 = vmatpush3.bf16.msra.mxu0 %v2570_v58  ;;  %2589 = vmatpush3.bf16.msra.mxu1 %v2570_v58 }
 0x782   :  { %1891 = vmatmul.mubr.f32.vlgmr.msra.gmra.mrb[16].mxu0 %v3191_v40  ;;  %1897 = vmatmul.mubr.f32.vlgmr.msra.gmra.mrb[16].mxu1 %v3423_v34 }
 0x783   :  { %1893 = vmatprep.mubr.f32.mxu0 %v3249_v12  ;;  %1899 = vmatprep.mubr.f32.mxu1 %v1415_v4 }
 0x786   :  { %1894 = vmatmul.mubr.f32.gmra.mrb[18].mxu0 %v3554_v3 }
 0x835   :  { %v1493_v21 = vpop.f32.mrb[14].mxu0  ;;  %v1564_v1 = vpop.f32.mrb[14].mxu1 }
 0x836   :  { %v1494_v31 = vadd.f32 %v1493_v21, %v3115_v43  ;;  %v1495_v2 = vpop.f32.mrb[15].mxu0  ;;  %v1566_v7 = vpop.f32.mrb[15].mxu1  ;;  %v1565_v12 = vadd.f32 %v1564_v1, %v3124_v17 }
 0x837   :  { %v1496_v8 = vadd.f32 %v1495_v2, %v3117_v48  ;;  %v1567_v40 = vadd.f32 %v1566_v7, %v3121_v60  ;;  %v3493_v60 = vld [vmem:[%s3546_s4] ss:$0 sm:$0xff]  ;;  %s2851_s4 = smov [#allocation10]  }
 0x838   :  { %v1830_v13 = vmul.f32 -1.442695, %v1494_v31  ;;  %s1759_s14 = sshll.u32 %s2851_s4, 4  ;;  %s1760_s14 = int_to_ptr.vmem [resolvable:$true] %s1759_s14 }
 0x839   :  { %v1831_v16 = vmul.f32 -1.442695, %v1496_v8  ;;  %v1832_v34 = vmul.f32 -1.442695, %v1567_v40  ;;  %s2771_s3 = scalar_lea.vmem %s1760_s14, 128  ;;  %p2776_p3 = scmp.lt.s32.totalorder %s1760_s14, %s1760_s14 }
 0x83a   :  { %2711 = vpow2.f32 %v1830_v13  ;;  %p2772_p2 = scmp.ne.s32.totalorder %s1760_s14, %s2771_s3  ;;  %p2777_p4 = scmp.lt.s32.totalorder %s2771_s3, %s2771_s3 }
 0x83b   :  { %2713 = vpow2.f32 %v1831_v16 }
 0x83c   :  { %2715 = vpow2.f32 %v1832_v34  ;;  %p2778_p5 = por %p2777_p4, %p2776_p3 }
 0x83d   :  { %2717 = vtanh.f32 %v1565_v12 }
 0x83e   :  { %p2779_p6 = pnand %p2778_p5, %p2772_p2 }
 0x844   :  { %v2712_v24 = vpop.eup %2711 }
 0x845   :  { %v2714_v25 = vpop.eup %2713  ;;  %v1572_v29 = vadd.f32 1.0, %v2712_v24 }
 0x846   :  { %v1578_v32 = vadd.f32 1.0, %v2714_v25  ;;  %v2716_v43 = vpop.eup %2715 }
 0x847   :  { %2719 = vrcp.f32 %v1572_v29  ;;  %v2718_v36 = vpop.eup %2717  ;;  %v1585_v45 = vadd.f32 1.0, %v2716_v43 }
 0x848   :  { %2721 = vrcp.f32 %v1578_v32 }
 0x849   :  { %2723 = vrcp.f32 %v1585_v45 }
 0x851   :  { %v2720_v48 = vpop.eup %2719 }
 0x852   :  { %v2722_v41 = vpop.eup %2721  ;;  %v1589_v44 = vmul.f32 %v2720_v48, %v2718_v36 }
 0x853   :  { %v1588_v47 = vmul.f32 %v2722_v41, %v3476_v46  ;;  %v2724_v35 = vpop.eup %2723 }
 0x855   :  { %v1892_v17 = vpop.f32.mrb[16].mxu0  ;;  %v1898_v51 = vpop.f32.mrb[16].mxu1  ;;  %v1590_v54 = vadd.f32 %v1589_v44, %v1588_v47 }
 0x856   :  { %v1698_v57 = vadd.f32 %v1892_v17, %v3493_v60  ;;  %v1718_v61 = vadd.f32 %v1898_v51, %v3493_v60  ;;  %v1692_v63 = vpop.f32.mrb[17].mxu0  ;;  %v1712_v5 = vpop.f32.mrb[17].mxu1 }
 0x857   :  { %v1693_v9 = vadd.f32 %v3493_v60, %v1692_v63  ;;  %v1713_v14 = vadd.f32 %v3493_v60, %v1712_v5  ;;  %2725 = vtanh.f32 %v1590_v54  ;;  %1740 = vst [vmem:[#allocation12] sm:$0xff] %v1590_v54 }
 0x858   :  { %1732 = vst [vmem:[#allocation9 + $0x8] sm:$0xff] %v1698_v57  ;;  %1736 = vst [vmem:[#allocation9 + $0x28] sm:$0xff] %v1718_v61 }
 0x859   :  { %1731 = vst [vmem:[#allocation9] sm:$0xff] %v1693_v9  ;;  %1735 = vst [vmem:[#allocation9 + $0x20] sm:$0xff] %v1713_v14  ;;  %v1895_v15 = vpop.f32.mrb[18].mxu0 }
 0x85a   :  { %v1708_v26 = vadd.f32 %v1895_v15, %v3493_v60  ;;  %v1702_v27 = vpop.f32.mrb[19].mxu0 }
 0x85b   :  { %v1703_v33 = vadd.f32 %v3493_v60, %v1702_v27 }
 0x85c   :  { %1734 = vst [vmem:[#allocation9 + $0x18] sm:$0xff] %v1708_v26 }
 0x85d   :  { %1733 = vst [vmem:[#allocation9 + $0x10] sm:$0xff] %v1703_v33 }
 0x861   :  { %v2726_v42 = vpop.eup %2725 }
 0x862   :  { %v1592_v46 = vmul.f32 %v2726_v42, %v2724_v35 }
 0x864   :  { %1900 = vmatmul.mubr.f32.gmra.mrb[18].mxu1 %v1592_v46  ;;  %1739 = vst [vmem:[#allocation10] sm:$0xff] %v1592_v46 }
 0x865   :  { %2782 = shalt.err (!%p2779_p6)
}
 0x866   :  { %s2783_s17 = scalar_lea.hbm %s3550_s8, 128 }
 0x867   :  { %p2784_p7 = scmp.ne.s32.totalorder %s3550_s8, %s2783_s17  ;;  %p2787_p8 = scmp.lt.u32.totalorder %s2783_s17, %s3550_s8 }
 0x869   :  { %p2789_p9 = pnand %p2787_p8, %p2784_p7 }
 0x86b   :  { %2792 = shalt.err (!%p2789_p9)
}
 0x86c   :  { %1762 = dma.vmem_to_hbm [thread:$0]  %s1760_s14, 128, %s3550_s8, [#allocation11]  }
 0x86d   :  { %s2852_s6 = smov [#allocation12]  }
 0x86e   :  { %s1769_s22 = sshll.u32 %s2852_s6, 4  ;;  %s1770_s22 = int_to_ptr.vmem [resolvable:$true] %s1769_s22 }
 0x86f   :  { %s2793_s23 = scalar_lea.vmem %s1770_s22, 128  ;;  %p2798_p11 = scmp.lt.s32.totalorder %s1770_s22, %s1770_s22 }
 0x870   :  { %p2794_p10 = scmp.ne.s32.totalorder %s1770_s22, %s2793_s23  ;;  %p2799_p12 = scmp.lt.s32.totalorder %s2793_s23, %s2793_s23 }
 0x872   :  { %p2800_p13 = por %p2799_p12, %p2798_p11 }
 0x874   :  { %p2801_p0 = pnand %p2800_p13, %p2794_p10 }
 0x876   :  { %2804 = shalt.err (!%p2801_p0)
}
 0x877   :  { %s2805_s26 = scalar_lea.hbm %s3551_s9, 128 }
 0x878   :  { %p2806_p1 = scmp.ne.s32.totalorder %s3551_s9, %s2805_s26  ;;  %p2809_p2 = scmp.lt.u32.totalorder %s2805_s26, %s3551_s9 }
 0x87a   :  { %p2811_p3 = pnand %p2809_p2, %p2806_p1 }
 0x87c   :  { %2814 = shalt.err (!%p2811_p3)
}
 0x87d   :  { %1772 = dma.vmem_to_hbm [thread:$0]  %s1770_s22, 128, %s3551_s9, [#allocation11]  }
 0x87e   :  { %s2853_s12 = smov [#allocation9]  }
 0x87f   :  { %s1746_s0 = sshll.u32 %s2853_s12, 4  ;;  %s1747_s0 = int_to_ptr.vmem [resolvable:$true] %s1746_s0 }
 0x880   :  { %s2815_s13 = scalar_lea.vmem %s1747_s0, 1024  ;;  %p2820_p5 = scmp.lt.s32.totalorder %s1747_s0, %s1747_s0 }
 0x881   :  { %p2816_p4 = scmp.ne.s32.totalorder %s1747_s0, %s2815_s13  ;;  %p2821_p6 = scmp.lt.s32.totalorder %s2815_s13, %s2815_s13 }
 0x883   :  { %p2822_p7 = por %p2821_p6, %p2820_p5 }
 0x885   :  { %p2823_p8 = pnand %p2822_p7, %p2816_p4 }
 0x937   :  { %v1901_v52 = vpop.f32.mrb[18].mxu1 }
 0x938   :  { %v1728_v55 = vadd.f32 %v1901_v52, %v3493_v60  ;;  %v1722_v62 = vpop.f32.mrb[19].mxu1 }
 0x939   :  { %v1723_v0 = vadd.f32 %v3493_v60, %v1722_v62 }
 0x93a   :  { %1738 = vst [vmem:[#allocation9 + $0x38] sm:$0xff] %v1728_v55 }
 0x93b   :  { %1737 = vst [vmem:[#allocation9 + $0x30] sm:$0xff] %v1723_v0 }
 0x93c   :  { %2826 = shalt.err (!%p2823_p8)
}
 0x93d   :  { %s2827_s14 = scalar_lea.hbm %s3549_s7, 1024 }
 0x93e   :  { %p2828_p9 = scmp.ne.s32.totalorder %s3549_s7, %s2827_s14  ;;  %p2831_p10 = scmp.lt.u32.totalorder %s2827_s14, %s3549_s7 }
 0x940   :  { %p2833_p11 = pnand %p2831_p10, %p2828_p9 }
 0x942   :  { %2836 = shalt.err (!%p2833_p11)
}
 0x943   :  { %1752 = dma.vmem_to_hbm [thread:$0]  %s1747_s0, 1024, %s3549_s7, [#allocation6], %s2849_s1, %s2849_s1, %s2850_s10  }
 0x944   :  { %2841 = dma.done.wait [#allocation6], 1024  }
 0x945   :  { %2842 = vsyncadd [#allocation6], 4294966272 }
 0x946   :  { %2843 = dma.done.wait [#allocation11], 256  }
 0x947   :  { %2844 = vsyncadd [#allocation11], 4294967040 }
 0x948   :  { %1782 = vsyncpa [#allocation5], 1 }
 0x949   :  { %1783 = vsyncpa [#allocation8], 1 }
 0x94a   :  { %1784 = vsyncpa [#allocation6], 1 }
 0x94b   :  { %1785 = vsyncpa [#allocation11], 1 }

</bundles_post_ra>
